<compile_context>
chip_gen: v7x
topology: tpu7x:2x2x1
jax: 0.10.0
libtpu: 0.0.40
codegen_flags: <defaults>
</compile_context>

<pallas_src>
import math

import jax
import jax.numpy as jnp
from jax import lax
from jax.experimental import pallas as pl
from jax.experimental.pallas import tpu as pltpu

# Model hyperparameters (small, consistent with the module's structure)
EMBED_DIM = 32
NUM_HEADS = 4
HEAD_DIM = EMBED_DIM // NUM_HEADS
MLP_SIZE = 64
SEQ_LEN = 8
BATCH = 2
LN_EPS = 1e-5


def _layernorm(v, gamma, beta):
    # v: (M, D); gamma/beta: (1, D)
    mu = jnp.mean(v, axis=-1, keepdims=True)
    var = jnp.mean((v - mu) ** 2, axis=-1, keepdims=True)
    return (v - mu) * lax.rsqrt(var + LN_EPS) * gamma + beta


def _erf(z):
    # Abramowitz & Stegun 7.1.26 rational approximation, |error| <= 1.5e-7.
    # Built from exp/mul/add/where only (safe Mosaic lowerings).
    p = jnp.float32(0.3275911)
    a1 = jnp.float32(0.254829592)
    a2 = jnp.float32(-0.284496736)
    a3 = jnp.float32(1.421413741)
    a4 = jnp.float32(-1.453152027)
    a5 = jnp.float32(1.061405429)
    az = jnp.abs(z)
    t = 1.0 / (1.0 + p * az)
    poly = ((((a5 * t + a4) * t + a3) * t + a2) * t + a1) * t
    y = 1.0 - poly * jnp.exp(-az * az)
    return jnp.where(z >= 0.0, y, -y)


def _gelu_exact(v):
    # torch nn.GELU() default = exact erf formulation
    return 0.5 * v * (1.0 + _erf(v * jnp.float32(1.0 / math.sqrt(2.0))))


def encoder_block_kernel(
    x_ref,                       # (B, S, D)
    ln1_g_ref, ln1_b_ref,        # (1, D)
    wq_ref, wk_ref, wv_ref,      # (D, D) each, [in, out] layout (pre-transposed on host)
    bq_ref, bk_ref, bv_ref,      # (1, D) each
    wo_ref, bo_ref,              # (D, D) [in, out], (1, D)
    ln2_g_ref, ln2_b_ref,        # (1, D)
    w1_ref, b1_ref,              # (D, MLP), (1, MLP)
    w2_ref, b2_ref,              # (MLP, D), (1, D)
    o_ref,                       # (B, S, D)
):
    B, S, D = x_ref.shape
    H = NUM_HEADS
    dh = D // H

    x = x_ref[...].astype(jnp.float32)           # (B, S, D)
    x2 = x.reshape(B * S, D)                     # all tokens on one matmul M-axis

    # ---- MultiheadSelfAttentionBlock: LayerNorm -> MHA (attn dropout p=0 per spec) ----
    h = _layernorm(x2, ln1_g_ref[...], ln1_b_ref[...])

    # Pre-split QKV: three lane-dense matmuls, no in-kernel .T.
    q = jnp.dot(h, wq_ref[...], preferred_element_type=jnp.float32) + bq_ref[...]
    k = jnp.dot(h, wk_ref[...], preferred_element_type=jnp.float32) + bk_ref[...]
    v = jnp.dot(h, wv_ref[...], preferred_element_type=jnp.float32) + bv_ref[...]

    def split_heads(t):  # (B*S, D) -> (H*B, S, dh): head-major batch axis for batched einsum
        parts = [t[:, i * dh:(i + 1) * dh].reshape(1, B, S, dh) for i in range(H)]
        return jnp.concatenate(parts, axis=0).reshape(H * B, S, dh)

    qh = split_heads(q)
    kh = split_heads(k)
    vh = split_heads(v)

    scale = jnp.float32(1.0 / math.sqrt(dh))
    # Single batched contraction over all (head, batch) pairs — no per-head matmul loop.
    scores = jnp.einsum('gqd,gkd->gqk', qh, kh,
                        preferred_element_type=jnp.float32) * scale    # (H*B, S, S)
    scores = scores - jnp.max(scores, axis=-1, keepdims=True)
    p = jnp.exp(scores)
    p = p / jnp.sum(p, axis=-1, keepdims=True)                         # exact softmax
    ctx = jnp.einsum('gqk,gkd->gqd', p, vh,
                     preferred_element_type=jnp.float32)               # (H*B, S, dh)

    ctx4 = ctx.reshape(H, B, S, dh)
    attn = jnp.concatenate([ctx4[i] for i in range(H)], axis=-1)       # (B, S, D)
    attn = attn.reshape(B * S, D)
    attn = jnp.dot(attn, wo_ref[...], preferred_element_type=jnp.float32) + bo_ref[...]

    # residual 1
    x2 = attn + x2

    # ---- MultiLayerPerceptron: LayerNorm -> Linear -> GELU -> Linear ----
    # TODO(synk): dropout (p=0.1) is treated as identity (eval mode / deterministic forward).
    h2 = _layernorm(x2, ln2_g_ref[...], ln2_b_ref[...])
    h2 = jnp.dot(h2, w1_ref[...], preferred_element_type=jnp.float32) + b1_ref[...]  # (B*S, MLP)
    h2 = _gelu_exact(h2)
    h2 = jnp.dot(h2, w2_ref[...], preferred_element_type=jnp.float32) + b2_ref[...]  # (B*S, D)

    # residual 2
    o_ref[...] = (h2 + x2).reshape(B, S, D).astype(o_ref.dtype)


def transformer_encoder_block(x, params):
    B, S, D = x.shape

    # Host-side (one-time, outside the kernel): transpose PyTorch [out, in] weights to
    # [in, out] so the kernel computes h @ W directly, and pre-split the fused QKV weights.
    wqkv_t = params["wqkv"].T                                  # (D, 3D)
    wq, wk, wv = wqkv_t[:, :D], wqkv_t[:, D:2 * D], wqkv_t[:, 2 * D:]
    bqkv = params["bqkv"]                                      # (1, 3D)
    bq, bk, bv = bqkv[:, :D], bqkv[:, D:2 * D], bqkv[:, 2 * D:]
    wo_t = params["wo"].T                                      # (D, D)
    w1_t = params["w1"].T                                      # (D, MLP)
    w2_t = params["w2"].T                                      # (MLP, D)

    inputs = (
        x,
        params["ln1_g"], params["ln1_b"],
        wq, wk, wv, bq, bk, bv,
        wo_t, params["bo"],
        params["ln2_g"], params["ln2_b"],
        w1_t, params["b1"],
        w2_t, params["b2"],
    )

    def full_spec(shape):
        nd = len(shape)
        return pl.BlockSpec(shape, lambda i, _nd=nd: (0,) * _nd)

    in_specs = [full_spec(a.shape) for a in inputs]

    return pl.pallas_call(
        encoder_block_kernel,
        out_shape=jax.ShapeDtypeStruct((B, S, D), x.dtype),
        grid_spec=pltpu.PrefetchScalarGridSpec(
            num_scalar_prefetch=0,
            grid=(1,),                      # entire batch in one step (tiny working set)
            in_specs=in_specs,
            out_specs=full_spec((B, S, D)),
        ),
        compiler_params=pltpu.CompilerParams(
            dimension_semantics=("arbitrary",)),
    )(*inputs)


def reference_forward(x, params):
    """Pure-JAX reference of the PyTorch module (eval mode) for a correctness check."""
    B, S, D = x.shape
    H, dh = NUM_HEADS, HEAD_DIM

    def ln(v, g, b):
        mu = v.mean(-1, keepdims=True)
        var = ((v - mu) ** 2).mean(-1, keepdims=True)
        return (v - mu) / jnp.sqrt(var + LN_EPS) * g + b

    h = ln(x, params["ln1_g"][0], params["ln1_b"][0])
    qkv = h @ params["wqkv"].T + params["bqkv"][0]
    q, k, v = qkv[..., :D], qkv[..., D:2 * D], qkv[..., 2 * D:]

    def heads(t):
        return t.reshape(B, S, H, dh).transpose(0, 2, 1, 3)

    qh, kh, vh = heads(q), heads(k), heads(v)
    s = jnp.einsum('bhqd,bhkd->bhqk', qh, kh) / math.sqrt(dh)
    p = jax.nn.softmax(s, axis=-1)
    ctx = jnp.einsum('bhqk,bhkd->bhqd', p, vh).transpose(0, 2, 1, 3).reshape(B, S, D)
    attn = ctx @ params["wo"].T + params["bo"][0]
    x = x + attn

    h2 = ln(x, params["ln2_g"][0], params["ln2_b"][0])
    h2 = h2 @ params["w1"].T + params["b1"][0]
    h2 = jax.nn.gelu(h2, approximate=False)
    h2 = h2 @ params["w2"].T + params["b2"][0]
    return x + h2


def init_params(key):
    ks = jax.random.split(key, 4)
    s = 0.02
    return {
        # LayerNorm 1
        "ln1_g": jnp.ones((1, EMBED_DIM), jnp.float32),
        "ln1_b": jnp.zeros((1, EMBED_DIM), jnp.float32),
        # MHA in_proj / out_proj (PyTorch layout: W is [out, in], y = x @ W.T + b)
        "wqkv": s * jax.random.normal(ks[0], (3 * EMBED_DIM, EMBED_DIM), jnp.float32),
        "bqkv": jnp.zeros((1, 3 * EMBED_DIM), jnp.float32),
        "wo":   s * jax.random.normal(ks[1], (EMBED_DIM, EMBED_DIM), jnp.float32),
        "bo":   jnp.zeros((1, EMBED_DIM), jnp.float32),
        # LayerNorm 2
        "ln2_g": jnp.ones((1, EMBED_DIM), jnp.float32),
        "ln2_b": jnp.zeros((1, EMBED_DIM), jnp.float32),
        # MLP
        "w1": s * jax.random.normal(ks[2], (MLP_SIZE, EMBED_DIM), jnp.float32),
        "b1": jnp.zeros((1, MLP_SIZE), jnp.float32),
        "w2": s * jax.random.normal(ks[3], (EMBED_DIM, MLP_SIZE), jnp.float32),
        "b2": jnp.zeros((1, EMBED_DIM), jnp.float32),
    }


if __name__ == "__main__":
    key = jax.random.PRNGKey(0)
    k_x, k_p = jax.random.split(key)
    x = jax.random.normal(k_x, (BATCH, SEQ_LEN, EMBED_DIM), jnp.float32)
    params = init_params(k_p)

    out = transformer_encoder_block(x, params)
    jax.block_until_ready(out)
    assert out.shape == (BATCH, SEQ_LEN, EMBED_DIM)

    ref = reference_forward(x, params)
    jax.block_until_ready(ref)
    max_err = float(jnp.max(jnp.abs(out - ref)))
    assert max_err < 1e-3, f"kernel mismatch vs reference: max_err={max_err}"

    print("KERNEL_OK")
</pallas_src>

<mosaic_0001>
module attributes {stable_mosaic.version = 11 : i64} {
  func.func @encoder_block_kernel(%arg0: i32, %arg1: memref<2x8x32xf32, #tpu.memory_space<vmem>>, %arg2: memref<1x32xf32, #tpu.memory_space<vmem>>, %arg3: memref<1x32xf32, #tpu.memory_space<vmem>>, %arg4: memref<32x32xf32, #tpu.memory_space<vmem>>, %arg5: memref<32x32xf32, #tpu.memory_space<vmem>>, %arg6: memref<32x32xf32, #tpu.memory_space<vmem>>, %arg7: memref<1x32xf32, #tpu.memory_space<vmem>>, %arg8: memref<1x32xf32, #tpu.memory_space<vmem>>, %arg9: memref<1x32xf32, #tpu.memory_space<vmem>>, %arg10: memref<32x32xf32, #tpu.memory_space<vmem>>, %arg11: memref<1x32xf32, #tpu.memory_space<vmem>>, %arg12: memref<1x32xf32, #tpu.memory_space<vmem>>, %arg13: memref<1x32xf32, #tpu.memory_space<vmem>>, %arg14: memref<32x64xf32, #tpu.memory_space<vmem>>, %arg15: memref<1x64xf32, #tpu.memory_space<vmem>>, %arg16: memref<64x32xf32, #tpu.memory_space<vmem>>, %arg17: memref<1x32xf32, #tpu.memory_space<vmem>>, %arg18: memref<2x8x32xf32, #tpu.memory_space<vmem>>) attributes {dimension_semantics = [#tpu.dimension_semantics<arbitrary>], iteration_bounds = array<i64: 1>, scalar_prefetch = 0 : i64, scratch_operands = 0 : i64, tpu.core_type = #tpu.core_type<tc>, window_params = [{pipeline_mode = #tpu.pipeline_mode<synchronous>, transform_indices = @transform_0, window_bounds = array<i64: 2, 8, 32>}, {pipeline_mode = #tpu.pipeline_mode<synchronous>, transform_indices = @transform_1, window_bounds = array<i64: 1, 32>}, {pipeline_mode = #tpu.pipeline_mode<synchronous>, transform_indices = @transform_2, window_bounds = array<i64: 1, 32>}, {pipeline_mode = #tpu.pipeline_mode<synchronous>, transform_indices = @transform_3, window_bounds = array<i64: 32, 32>}, {pipeline_mode = #tpu.pipeline_mode<synchronous>, transform_indices = @transform_4, window_bounds = array<i64: 32, 32>}, {pipeline_mode = #tpu.pipeline_mode<synchronous>, transform_indices = @transform_5, window_bounds = array<i64: 32, 32>}, {pipeline_mode = #tpu.pipeline_mode<synchronous>, transform_indices = @transform_6, window_bounds = array<i64: 1, 32>}, {pipeline_mode = #tpu.pipeline_mode<synchronous>, transform_indices = @transform_7, window_bounds = array<i64: 1, 32>}, {pipeline_mode = #tpu.pipeline_mode<synchronous>, transform_indices = @transform_8, window_bounds = array<i64: 1, 32>}, {pipeline_mode = #tpu.pipeline_mode<synchronous>, transform_indices = @transform_9, window_bounds = array<i64: 32, 32>}, {pipeline_mode = #tpu.pipeline_mode<synchronous>, transform_indices = @transform_10, window_bounds = array<i64: 1, 32>}, {pipeline_mode = #tpu.pipeline_mode<synchronous>, transform_indices = @transform_11, window_bounds = array<i64: 1, 32>}, {pipeline_mode = #tpu.pipeline_mode<synchronous>, transform_indices = @transform_12, window_bounds = array<i64: 1, 32>}, {pipeline_mode = #tpu.pipeline_mode<synchronous>, transform_indices = @transform_13, window_bounds = array<i64: 32, 64>}, {pipeline_mode = #tpu.pipeline_mode<synchronous>, transform_indices = @transform_14, window_bounds = array<i64: 1, 64>}, {pipeline_mode = #tpu.pipeline_mode<synchronous>, transform_indices = @transform_15, window_bounds = array<i64: 64, 32>}, {pipeline_mode = #tpu.pipeline_mode<synchronous>, transform_indices = @transform_16, window_bounds = array<i64: 1, 32>}, {pipeline_mode = #tpu.pipeline_mode<synchronous>, transform_indices = @transform_17, window_bounds = array<i64: 2, 8, 32>}]} {
    %c0 = arith.constant 0 : index
    %c0_0 = arith.constant 0 : index
    %c0_1 = arith.constant 0 : index
    %0 = vector.load %arg1[%c0, %c0_0, %c0_1] : memref<2x8x32xf32, #tpu.memory_space<vmem>>, vector<2x8x32xf32>
    %1 = vector.shape_cast %0 : vector<2x8x32xf32> to vector<16x32xf32>
    %c0_2 = arith.constant 0 : index
    %c0_3 = arith.constant 0 : index
    %2 = vector.load %arg2[%c0_2, %c0_3] : memref<1x32xf32, #tpu.memory_space<vmem>>, vector<1x32xf32>
    %c0_4 = arith.constant 0 : index
    %c0_5 = arith.constant 0 : index
    %3 = vector.load %arg3[%c0_4, %c0_5] : memref<1x32xf32, #tpu.memory_space<vmem>>, vector<1x32xf32>
    %cst = arith.constant dense<0.000000e+00> : vector<16xf32>
    %4 = vector.multi_reduction <add>, %1, %cst [1] : vector<16x32xf32> to vector<16xf32>
    %5 = vector.shape_cast %4 : vector<16xf32> to vector<16x1xf32>
    %cst_6 = arith.constant 3.200000e+01 : f32
    %6 = vector.broadcast %cst_6 : f32 to vector<16x1xf32>
    %7 = arith.divf %5, %6 : vector<16x1xf32>
    %8 = vector.broadcast %7 : vector<16x1xf32> to vector<16x32xf32>
    %9 = arith.subf %1, %8 : vector<16x32xf32>
    %10 = arith.mulf %9, %9 : vector<16x32xf32>
    %cst_7 = arith.constant dense<0.000000e+00> : vector<16xf32>
    %11 = vector.multi_reduction <add>, %10, %cst_7 [1] : vector<16x32xf32> to vector<16xf32>
    %12 = vector.shape_cast %11 : vector<16xf32> to vector<16x1xf32>
    %cst_8 = arith.constant 3.200000e+01 : f32
    %13 = vector.broadcast %cst_8 : f32 to vector<16x1xf32>
    %14 = arith.divf %12, %13 : vector<16x1xf32>
    %15 = vector.broadcast %7 : vector<16x1xf32> to vector<16x32xf32>
    %16 = arith.subf %1, %15 : vector<16x32xf32>
    %cst_9 = arith.constant 9.99999974E-6 : f32
    %17 = vector.broadcast %cst_9 : f32 to vector<16x1xf32>
    %18 = arith.addf %14, %17 : vector<16x1xf32>
    %19 = math.rsqrt %18 : vector<16x1xf32>
    %20 = vector.broadcast %19 : vector<16x1xf32> to vector<16x32xf32>
    %21 = arith.mulf %16, %20 : vector<16x32xf32>
    %22 = vector.broadcast %2 : vector<1x32xf32> to vector<16x32xf32>
    %23 = arith.mulf %21, %22 : vector<16x32xf32>
    %24 = vector.broadcast %3 : vector<1x32xf32> to vector<16x32xf32>
    %25 = arith.addf %23, %24 : vector<16x32xf32>
    %c0_10 = arith.constant 0 : index
    %c0_11 = arith.constant 0 : index
    %26 = vector.load %arg4[%c0_10, %c0_11] : memref<32x32xf32, #tpu.memory_space<vmem>>, vector<32x32xf32>
    %cst_12 = arith.constant dense<0.000000e+00> : vector<16x32xf32>
    %27 = tpu.matmul %25, %26, %cst_12 {dimension_numbers = #tpu.dot_dimension_numbers<[1], [0], [0], [1], [0, 0, 1, 1], [], []>} : vector<16x32xf32>, vector<32x32xf32>, vector<16x32xf32> -> vector<16x32xf32>
    %c0_13 = arith.constant 0 : index
    %c0_14 = arith.constant 0 : index
    %28 = vector.load %arg7[%c0_13, %c0_14] : memref<1x32xf32, #tpu.memory_space<vmem>>, vector<1x32xf32>
    %29 = vector.broadcast %28 : vector<1x32xf32> to vector<16x32xf32>
    %30 = arith.addf %27, %29 : vector<16x32xf32>
    %c0_15 = arith.constant 0 : index
    %c0_16 = arith.constant 0 : index
    %31 = vector.load %arg5[%c0_15, %c0_16] : memref<32x32xf32, #tpu.memory_space<vmem>>, vector<32x32xf32>
    %cst_17 = arith.constant dense<0.000000e+00> : vector<16x32xf32>
    %32 = tpu.matmul %25, %31, %cst_17 {dimension_numbers = #tpu.dot_dimension_numbers<[1], [0], [0], [1], [0, 0, 1, 1], [], []>} : vector<16x32xf32>, vector<32x32xf32>, vector<16x32xf32> -> vector<16x32xf32>
    %c0_18 = arith.constant 0 : index
    %c0_19 = arith.constant 0 : index
    %33 = vector.load %arg8[%c0_18, %c0_19] : memref<1x32xf32, #tpu.memory_space<vmem>>, vector<1x32xf32>
    %34 = vector.broadcast %33 : vector<1x32xf32> to vector<16x32xf32>
    %35 = arith.addf %32, %34 : vector<16x32xf32>
    %c0_20 = arith.constant 0 : index
    %c0_21 = arith.constant 0 : index
    %36 = vector.load %arg6[%c0_20, %c0_21] : memref<32x32xf32, #tpu.memory_space<vmem>>, vector<32x32xf32>
    %cst_22 = arith.constant dense<0.000000e+00> : vector<16x32xf32>
    %37 = tpu.matmul %25, %36, %cst_22 {dimension_numbers = #tpu.dot_dimension_numbers<[1], [0], [0], [1], [0, 0, 1, 1], [], []>} : vector<16x32xf32>, vector<32x32xf32>, vector<16x32xf32> -> vector<16x32xf32>
    %c0_23 = arith.constant 0 : index
    %c0_24 = arith.constant 0 : index
    %38 = vector.load %arg9[%c0_23, %c0_24] : memref<1x32xf32, #tpu.memory_space<vmem>>, vector<1x32xf32>
    %39 = vector.broadcast %38 : vector<1x32xf32> to vector<16x32xf32>
    %40 = arith.addf %37, %39 : vector<16x32xf32>
    %41 = vector.extract_strided_slice %30 {offsets = [0, 0], sizes = [16, 8], strides = [1, 1]} : vector<16x32xf32> to vector<16x8xf32>
    %42 = vector.shape_cast %41 : vector<16x8xf32> to vector<1x2x8x8xf32>
    %43 = vector.extract_strided_slice %30 {offsets = [0, 8], sizes = [16, 8], strides = [1, 1]} : vector<16x32xf32> to vector<16x8xf32>
    %44 = vector.shape_cast %43 : vector<16x8xf32> to vector<1x2x8x8xf32>
    %45 = vector.extract_strided_slice %30 {offsets = [0, 16], sizes = [16, 8], strides = [1, 1]} : vector<16x32xf32> to vector<16x8xf32>
    %46 = vector.shape_cast %45 : vector<16x8xf32> to vector<1x2x8x8xf32>
    %47 = vector.extract_strided_slice %30 {offsets = [0, 24], sizes = [16, 8], strides = [1, 1]} : vector<16x32xf32> to vector<16x8xf32>
    %48 = vector.shape_cast %47 : vector<16x8xf32> to vector<1x2x8x8xf32>
    %49 = tpu.concatenate %42, %44, %46, %48 in 0 : vector<1x2x8x8xf32>, vector<1x2x8x8xf32>, vector<1x2x8x8xf32>, vector<1x2x8x8xf32> -> vector<4x2x8x8xf32>
    %50 = vector.shape_cast %49 : vector<4x2x8x8xf32> to vector<8x8x8xf32>
    %51 = vector.extract_strided_slice %35 {offsets = [0, 0], sizes = [16, 8], strides = [1, 1]} : vector<16x32xf32> to vector<16x8xf32>
    %52 = vector.shape_cast %51 : vector<16x8xf32> to vector<1x2x8x8xf32>
    %53 = vector.extract_strided_slice %35 {offsets = [0, 8], sizes = [16, 8], strides = [1, 1]} : vector<16x32xf32> to vector<16x8xf32>
    %54 = vector.shape_cast %53 : vector<16x8xf32> to vector<1x2x8x8xf32>
    %55 = vector.extract_strided_slice %35 {offsets = [0, 16], sizes = [16, 8], strides = [1, 1]} : vector<16x32xf32> to vector<16x8xf32>
    %56 = vector.shape_cast %55 : vector<16x8xf32> to vector<1x2x8x8xf32>
    %57 = vector.extract_strided_slice %35 {offsets = [0, 24], sizes = [16, 8], strides = [1, 1]} : vector<16x32xf32> to vector<16x8xf32>
    %58 = vector.shape_cast %57 : vector<16x8xf32> to vector<1x2x8x8xf32>
    %59 = tpu.concatenate %52, %54, %56, %58 in 0 : vector<1x2x8x8xf32>, vector<1x2x8x8xf32>, vector<1x2x8x8xf32>, vector<1x2x8x8xf32> -> vector<4x2x8x8xf32>
    %60 = vector.shape_cast %59 : vector<4x2x8x8xf32> to vector<8x8x8xf32>
    %61 = vector.extract_strided_slice %40 {offsets = [0, 0], sizes = [16, 8], strides = [1, 1]} : vector<16x32xf32> to vector<16x8xf32>
    %62 = vector.shape_cast %61 : vector<16x8xf32> to vector<1x2x8x8xf32>
    %63 = vector.extract_strided_slice %40 {offsets = [0, 8], sizes = [16, 8], strides = [1, 1]} : vector<16x32xf32> to vector<16x8xf32>
    %64 = vector.shape_cast %63 : vector<16x8xf32> to vector<1x2x8x8xf32>
    %65 = vector.extract_strided_slice %40 {offsets = [0, 16], sizes = [16, 8], strides = [1, 1]} : vector<16x32xf32> to vector<16x8xf32>
    %66 = vector.shape_cast %65 : vector<16x8xf32> to vector<1x2x8x8xf32>
    %67 = vector.extract_strided_slice %40 {offsets = [0, 24], sizes = [16, 8], strides = [1, 1]} : vector<16x32xf32> to vector<16x8xf32>
    %68 = vector.shape_cast %67 : vector<16x8xf32> to vector<1x2x8x8xf32>
    %69 = tpu.concatenate %62, %64, %66, %68 in 0 : vector<1x2x8x8xf32>, vector<1x2x8x8xf32>, vector<1x2x8x8xf32>, vector<1x2x8x8xf32> -> vector<4x2x8x8xf32>
    %70 = vector.shape_cast %69 : vector<4x2x8x8xf32> to vector<8x8x8xf32>
    "tpu.trace_start"() <{level = 10 : i32, message = "gqd,gkd->gqk"}> : () -> ()
    %cst_25 = arith.constant dense<0.000000e+00> : vector<8x8x8xf32>
    %71 = tpu.matmul %50, %60, %cst_25 {dimension_numbers = #tpu.dot_dimension_numbers<[2], [2], [1], [1], [0, 0, 0, 1, 1, 1], [0], [0]>} : vector<8x8x8xf32>, vector<8x8x8xf32>, vector<8x8x8xf32> -> vector<8x8x8xf32>
    "tpu.trace_stop"() : () -> ()
    %cst_26 = arith.constant 0.353553385 : f32
    %72 = vector.broadcast %cst_26 : f32 to vector<8x8x8xf32>
    %73 = arith.mulf %71, %72 : vector<8x8x8xf32>
    %cst_27 = arith.constant dense<0xFF800000> : vector<8x8xf32>
    %74 = vector.multi_reduction <maximumf>, %73, %cst_27 [2] : vector<8x8x8xf32> to vector<8x8xf32>
    %75 = vector.shape_cast %74 : vector<8x8xf32> to vector<8x8x1xf32>
    %76 = vector.broadcast %75 : vector<8x8x1xf32> to vector<8x8x8xf32>
    %77 = arith.subf %73, %76 : vector<8x8x8xf32>
    %78 = math.exp %77 : vector<8x8x8xf32>
    %cst_28 = arith.constant dense<0.000000e+00> : vector<8x8xf32>
    %79 = vector.multi_reduction <add>, %78, %cst_28 [2] : vector<8x8x8xf32> to vector<8x8xf32>
    %80 = vector.shape_cast %79 : vector<8x8xf32> to vector<8x8x1xf32>
    %81 = vector.broadcast %80 : vector<8x8x1xf32> to vector<8x8x8xf32>
    %82 = arith.divf %78, %81 : vector<8x8x8xf32>
    "tpu.trace_start"() <{level = 10 : i32, message = "gqk,gkd->gqd"}> : () -> ()
    %cst_29 = arith.constant dense<0.000000e+00> : vector<8x8x8xf32>
    %83 = tpu.matmul %82, %70, %cst_29 {dimension_numbers = #tpu.dot_dimension_numbers<[2], [1], [1], [2], [0, 0, 0, 1, 1, 2], [0], [0]>} : vector<8x8x8xf32>, vector<8x8x8xf32>, vector<8x8x8xf32> -> vector<8x8x8xf32>
    "tpu.trace_stop"() : () -> ()
    %84 = vector.shape_cast %83 : vector<8x8x8xf32> to vector<4x2x8x8xf32>
    %85 = vector.extract_strided_slice %84 {offsets = [0, 0, 0, 0], sizes = [1, 2, 8, 8], strides = [1, 1, 1, 1]} : vector<4x2x8x8xf32> to vector<1x2x8x8xf32>
    %86 = vector.shape_cast %85 : vector<1x2x8x8xf32> to vector<2x8x8xf32>
    %87 = vector.extract_strided_slice %84 {offsets = [1, 0, 0, 0], sizes = [1, 2, 8, 8], strides = [1, 1, 1, 1]} : vector<4x2x8x8xf32> to vector<1x2x8x8xf32>
    %88 = vector.shape_cast %87 : vector<1x2x8x8xf32> to vector<2x8x8xf32>
    %89 = vector.extract_strided_slice %84 {offsets = [2, 0, 0, 0], sizes = [1, 2, 8, 8], strides = [1, 1, 1, 1]} : vector<4x2x8x8xf32> to vector<1x2x8x8xf32>
    %90 = vector.shape_cast %89 : vector<1x2x8x8xf32> to vector<2x8x8xf32>
    %91 = vector.extract_strided_slice %84 {offsets = [3, 0, 0, 0], sizes = [1, 2, 8, 8], strides = [1, 1, 1, 1]} : vector<4x2x8x8xf32> to vector<1x2x8x8xf32>
    %92 = vector.shape_cast %91 : vector<1x2x8x8xf32> to vector<2x8x8xf32>
    %93 = tpu.concatenate %86, %88, %90, %92 in 2 : vector<2x8x8xf32>, vector<2x8x8xf32>, vector<2x8x8xf32>, vector<2x8x8xf32> -> vector<2x8x32xf32>
    %94 = vector.shape_cast %93 : vector<2x8x32xf32> to vector<16x32xf32>
    %c0_30 = arith.constant 0 : index
    %c0_31 = arith.constant 0 : index
    %95 = vector.load %arg10[%c0_30, %c0_31] : memref<32x32xf32, #tpu.memory_space<vmem>>, vector<32x32xf32>
    %cst_32 = arith.constant dense<0.000000e+00> : vector<16x32xf32>
    %96 = tpu.matmul %94, %95, %cst_32 {dimension_numbers = #tpu.dot_dimension_numbers<[1], [0], [0], [1], [0, 0, 1, 1], [], []>} : vector<16x32xf32>, vector<32x32xf32>, vector<16x32xf32> -> vector<16x32xf32>
    %c0_33 = arith.constant 0 : index
    %c0_34 = arith.constant 0 : index
    %97 = vector.load %arg11[%c0_33, %c0_34] : memref<1x32xf32, #tpu.memory_space<vmem>>, vector<1x32xf32>
    %98 = vector.broadcast %97 : vector<1x32xf32> to vector<16x32xf32>
    %99 = arith.addf %96, %98 : vector<16x32xf32>
    %100 = arith.addf %99, %1 : vector<16x32xf32>
    %c0_35 = arith.constant 0 : index
    %c0_36 = arith.constant 0 : index
    %101 = vector.load %arg12[%c0_35, %c0_36] : memref<1x32xf32, #tpu.memory_space<vmem>>, vector<1x32xf32>
    %c0_37 = arith.constant 0 : index
    %c0_38 = arith.constant 0 : index
    %102 = vector.load %arg13[%c0_37, %c0_38] : memref<1x32xf32, #tpu.memory_space<vmem>>, vector<1x32xf32>
    %cst_39 = arith.constant dense<0.000000e+00> : vector<16xf32>
    %103 = vector.multi_reduction <add>, %100, %cst_39 [1] : vector<16x32xf32> to vector<16xf32>
    %104 = vector.shape_cast %103 : vector<16xf32> to vector<16x1xf32>
    %cst_40 = arith.constant 3.200000e+01 : f32
    %105 = vector.broadcast %cst_40 : f32 to vector<16x1xf32>
    %106 = arith.divf %104, %105 : vector<16x1xf32>
    %107 = vector.broadcast %106 : vector<16x1xf32> to vector<16x32xf32>
    %108 = arith.subf %100, %107 : vector<16x32xf32>
    %109 = arith.mulf %108, %108 : vector<16x32xf32>
    %cst_41 = arith.constant dense<0.000000e+00> : vector<16xf32>
    %110 = vector.multi_reduction <add>, %109, %cst_41 [1] : vector<16x32xf32> to vector<16xf32>
    %111 = vector.shape_cast %110 : vector<16xf32> to vector<16x1xf32>
    %cst_42 = arith.constant 3.200000e+01 : f32
    %112 = vector.broadcast %cst_42 : f32 to vector<16x1xf32>
    %113 = arith.divf %111, %112 : vector<16x1xf32>
    %114 = vector.broadcast %106 : vector<16x1xf32> to vector<16x32xf32>
    %115 = arith.subf %100, %114 : vector<16x32xf32>
    %cst_43 = arith.constant 9.99999974E-6 : f32
    %116 = vector.broadcast %cst_43 : f32 to vector<16x1xf32>
    %117 = arith.addf %113, %116 : vector<16x1xf32>
    %118 = math.rsqrt %117 : vector<16x1xf32>
    %119 = vector.broadcast %118 : vector<16x1xf32> to vector<16x32xf32>
    %120 = arith.mulf %115, %119 : vector<16x32xf32>
    %121 = vector.broadcast %101 : vector<1x32xf32> to vector<16x32xf32>
    %122 = arith.mulf %120, %121 : vector<16x32xf32>
    %123 = vector.broadcast %102 : vector<1x32xf32> to vector<16x32xf32>
    %124 = arith.addf %122, %123 : vector<16x32xf32>
    %c0_44 = arith.constant 0 : index
    %c0_45 = arith.constant 0 : index
    %125 = vector.load %arg14[%c0_44, %c0_45] : memref<32x64xf32, #tpu.memory_space<vmem>>, vector<32x64xf32>
    %cst_46 = arith.constant dense<0.000000e+00> : vector<16x64xf32>
    %126 = tpu.matmul %124, %125, %cst_46 {dimension_numbers = #tpu.dot_dimension_numbers<[1], [0], [0], [1], [0, 0, 1, 1], [], []>} : vector<16x32xf32>, vector<32x64xf32>, vector<16x64xf32> -> vector<16x64xf32>
    %c0_47 = arith.constant 0 : index
    %c0_48 = arith.constant 0 : index
    %127 = vector.load %arg15[%c0_47, %c0_48] : memref<1x64xf32, #tpu.memory_space<vmem>>, vector<1x64xf32>
    %128 = vector.broadcast %127 : vector<1x64xf32> to vector<16x64xf32>
    %129 = arith.addf %126, %128 : vector<16x64xf32>
    %cst_49 = arith.constant 5.000000e-01 : f32
    %130 = vector.broadcast %cst_49 : f32 to vector<16x64xf32>
    %131 = arith.mulf %130, %129 : vector<16x64xf32>
    %cst_50 = arith.constant 0.707106769 : f32
    %132 = vector.broadcast %cst_50 : f32 to vector<16x64xf32>
    %133 = arith.mulf %129, %132 : vector<16x64xf32>
    %134 = math.absf %133 : vector<16x64xf32>
    %cst_51 = arith.constant 0.327591091 : f32
    %135 = vector.broadcast %cst_51 : f32 to vector<16x64xf32>
    %136 = arith.mulf %135, %134 : vector<16x64xf32>
    %cst_52 = arith.constant 1.000000e+00 : f32
    %137 = vector.broadcast %cst_52 : f32 to vector<16x64xf32>
    %138 = arith.addf %137, %136 : vector<16x64xf32>
    %cst_53 = arith.constant 1.000000e+00 : f32
    %139 = vector.broadcast %cst_53 : f32 to vector<16x64xf32>
    %140 = arith.divf %139, %138 : vector<16x64xf32>
    %cst_54 = arith.constant 1.06140542 : f32
    %141 = vector.broadcast %cst_54 : f32 to vector<16x64xf32>
    %142 = arith.mulf %141, %140 : vector<16x64xf32>
    %cst_55 = arith.constant -1.45315206 : f32
    %143 = vector.broadcast %cst_55 : f32 to vector<16x64xf32>
    %144 = arith.addf %142, %143 : vector<16x64xf32>
    %145 = arith.mulf %144, %140 : vector<16x64xf32>
    %cst_56 = arith.constant 1.42141378 : f32
    %146 = vector.broadcast %cst_56 : f32 to vector<16x64xf32>
    %147 = arith.addf %145, %146 : vector<16x64xf32>
    %148 = arith.mulf %147, %140 : vector<16x64xf32>
    %cst_57 = arith.constant -0.284496725 : f32
    %149 = vector.broadcast %cst_57 : f32 to vector<16x64xf32>
    %150 = arith.addf %148, %149 : vector<16x64xf32>
    %151 = arith.mulf %150, %140 : vector<16x64xf32>
    %cst_58 = arith.constant 0.254829586 : f32
    %152 = vector.broadcast %cst_58 : f32 to vector<16x64xf32>
    %153 = arith.addf %151, %152 : vector<16x64xf32>
    %154 = arith.mulf %153, %140 : vector<16x64xf32>
    %cst_59 = arith.constant 0.000000e+00 : f32
    %155 = vector.broadcast %cst_59 : f32 to vector<16x64xf32>
    %156 = arith.subf %155, %134 : vector<16x64xf32>
    %157 = arith.mulf %156, %134 : vector<16x64xf32>
    %158 = math.exp %157 : vector<16x64xf32>
    %159 = arith.mulf %154, %158 : vector<16x64xf32>
    %cst_60 = arith.constant 1.000000e+00 : f32
    %160 = vector.broadcast %cst_60 : f32 to vector<16x64xf32>
    %161 = arith.subf %160, %159 : vector<16x64xf32>
    %cst_61 = arith.constant 0.000000e+00 : f32
    %162 = vector.broadcast %cst_61 : f32 to vector<16x64xf32>
    %163 = arith.cmpf oge, %133, %162 : vector<16x64xf32>
    %cst_62 = arith.constant 0.000000e+00 : f32
    %164 = vector.broadcast %cst_62 : f32 to vector<16x64xf32>
    %165 = arith.subf %164, %161 : vector<16x64xf32>
    %166 = arith.select %163, %161, %165 : vector<16x64xi1>, vector<16x64xf32>
    %cst_63 = arith.constant 1.000000e+00 : f32
    %167 = vector.broadcast %cst_63 : f32 to vector<16x64xf32>
    %168 = arith.addf %167, %166 : vector<16x64xf32>
    %169 = arith.mulf %131, %168 : vector<16x64xf32>
    %c0_64 = arith.constant 0 : index
    %c0_65 = arith.constant 0 : index
    %170 = vector.load %arg16[%c0_64, %c0_65] : memref<64x32xf32, #tpu.memory_space<vmem>>, vector<64x32xf32>
    %cst_66 = arith.constant dense<0.000000e+00> : vector<16x32xf32>
    %171 = tpu.matmul %169, %170, %cst_66 {dimension_numbers = #tpu.dot_dimension_numbers<[1], [0], [0], [1], [0, 0, 1, 1], [], []>} : vector<16x64xf32>, vector<64x32xf32>, vector<16x32xf32> -> vector<16x32xf32>
    %c0_67 = arith.constant 0 : index
    %c0_68 = arith.constant 0 : index
    %172 = vector.load %arg17[%c0_67, %c0_68] : memref<1x32xf32, #tpu.memory_space<vmem>>, vector<1x32xf32>
    %173 = vector.broadcast %172 : vector<1x32xf32> to vector<16x32xf32>
    %174 = arith.addf %171, %173 : vector<16x32xf32>
    %175 = arith.addf %174, %100 : vector<16x32xf32>
    %176 = vector.shape_cast %175 : vector<16x32xf32> to vector<2x8x32xf32>
    %c0_69 = arith.constant 0 : index
    %c0_70 = arith.constant 0 : index
    %c0_71 = arith.constant 0 : index
    %177 = vector.load %arg18[%c0_69, %c0_70, %c0_71] : memref<2x8x32xf32, #tpu.memory_space<vmem>>, vector<2x8x32xf32>
    tpu.vector_store %arg18[%c0_69, %c0_70, %c0_71], %176 {strides = array<i32>} : memref<2x8x32xf32, #tpu.memory_space<vmem>>, vector<2x8x32xf32>,
    return
  }
  func.func @transform_0(%arg0: i32) -> (i32, i32, i32) {
    %c0_i32 = arith.constant 0 : i32
    %c0_i32_0 = arith.constant 0 : i32
    %c0_i32_1 = arith.constant 0 : i32
    %c0_i32_2 = arith.constant 0 : i32
    return %c0_i32, %c0_i32_0, %c0_i32_1 : i32, i32, i32
  }
  func.func @transform_1(%arg0: i32) -> (i32, i32) {
    %c0_i32 = arith.constant 0 : i32
    %c0_i32_0 = arith.constant 0 : i32
    %c0_i32_1 = arith.constant 0 : i32
    return %c0_i32, %c0_i32_0 : i32, i32
  }
  func.func @transform_2(%arg0: i32) -> (i32, i32) {
    %c0_i32 = arith.constant 0 : i32
    %c0_i32_0 = arith.constant 0 : i32
    %c0_i32_1 = arith.constant 0 : i32
    return %c0_i32, %c0_i32_0 : i32, i32
  }
  func.func @transform_3(%arg0: i32) -> (i32, i32) {
    %c0_i32 = arith.constant 0 : i32
    %c0_i32_0 = arith.constant 0 : i32
    %c0_i32_1 = arith.constant 0 : i32
    return %c0_i32, %c0_i32_0 : i32, i32
  }
  func.func @transform_4(%arg0: i32) -> (i32, i32) {
    %c0_i32 = arith.constant 0 : i32
    %c0_i32_0 = arith.constant 0 : i32
    %c0_i32_1 = arith.constant 0 : i32
    return %c0_i32, %c0_i32_0 : i32, i32
  }
  func.func @transform_5(%arg0: i32) -> (i32, i32) {
    %c0_i32 = arith.constant 0 : i32
    %c0_i32_0 = arith.constant 0 : i32
    %c0_i32_1 = arith.constant 0 : i32
    return %c0_i32, %c0_i32_0 : i32, i32
  }
  func.func @transform_6(%arg0: i32) -> (i32, i32) {
    %c0_i32 = arith.constant 0 : i32
    %c0_i32_0 = arith.constant 0 : i32
    %c0_i32_1 = arith.constant 0 : i32
    return %c0_i32, %c0_i32_0 : i32, i32
  }
  func.func @transform_7(%arg0: i32) -> (i32, i32) {
    %c0_i32 = arith.constant 0 : i32
    %c0_i32_0 = arith.constant 0 : i32
    %c0_i32_1 = arith.constant 0 : i32
    return %c0_i32, %c0_i32_0 : i32, i32
  }
  func.func @transform_8(%arg0: i32) -> (i32, i32) {
    %c0_i32 = arith.constant 0 : i32
    %c0_i32_0 = arith.constant 0 : i32
    %c0_i32_1 = arith.constant 0 : i32
    return %c0_i32, %c0_i32_0 : i32, i32
  }
  func.func @transform_9(%arg0: i32) -> (i32, i32) {
    %c0_i32 = arith.constant 0 : i32
    %c0_i32_0 = arith.constant 0 : i32
    %c0_i32_1 = arith.constant 0 : i32
    return %c0_i32, %c0_i32_0 : i32, i32
  }
  func.func @transform_10(%arg0: i32) -> (i32, i32) {
    %c0_i32 = arith.constant 0 : i32
    %c0_i32_0 = arith.constant 0 : i32
    %c0_i32_1 = arith.constant 0 : i32
    return %c0_i32, %c0_i32_0 : i32, i32
  }
  func.func @transform_11(%arg0: i32) -> (i32, i32) {
    %c0_i32 = arith.constant 0 : i32
    %c0_i32_0 = arith.constant 0 : i32
    %c0_i32_1 = arith.constant 0 : i32
    return %c0_i32, %c0_i32_0 : i32, i32
  }
  func.func @transform_12(%arg0: i32) -> (i32, i32) {
    %c0_i32 = arith.constant 0 : i32
    %c0_i32_0 = arith.constant 0 : i32
    %c0_i32_1 = arith.constant 0 : i32
    return %c0_i32, %c0_i32_0 : i32, i32
  }
  func.func @transform_13(%arg0: i32) -> (i32, i32) {
    %c0_i32 = arith.constant 0 : i32
    %c0_i32_0 = arith.constant 0 : i32
    %c0_i32_1 = arith.constant 0 : i32
    return %c0_i32, %c0_i32_0 : i32, i32
  }
  func.func @transform_14(%arg0: i32) -> (i32, i32) {
    %c0_i32 = arith.constant 0 : i32
    %c0_i32_0 = arith.constant 0 : i32
    %c0_i32_1 = arith.constant 0 : i32
    return %c0_i32, %c0_i32_0 : i32, i32
  }
  func.func @transform_15(%arg0: i32) -> (i32, i32) {
    %c0_i32 = arith.constant 0 : i32
    %c0_i32_0 = arith.constant 0 : i32
    %c0_i32_1 = arith.constant 0 : i32
    return %c0_i32, %c0_i32_0 : i32, i32
  }
  func.func @transform_16(%arg0: i32) -> (i32, i32) {
    %c0_i32 = arith.constant 0 : i32
    %c0_i32_0 = arith.constant 0 : i32
    %c0_i32_1 = arith.constant 0 : i32
    return %c0_i32, %c0_i32_0 : i32, i32
  }
  func.func @transform_17(%arg0: i32) -> (i32, i32, i32) {
    %c0_i32 = arith.constant 0 : i32
    %c0_i32_0 = arith.constant 0 : i32
    %c0_i32_1 = arith.constant 0 : i32
    %c0_i32_2 = arith.constant 0 : i32
    return %c0_i32, %c0_i32_0, %c0_i32_1 : i32, i32, i32
  }
}

</mosaic_0001>

<bundles_post_ra>
// kernel: tpu_custom_call.1
= control target key start
LH: loop header
LB: loop body
LE: loop exit
PB: predicated region body
PF: predicated region fallthrough
CT: control target
= control target key end

     0   :  { %s3078_s0 = inlined_call_operand.hbm [shape: f32[2,8,32], index: 0, kind: input, shape index: {}]   ;;  %s3079_s1 = inlined_call_operand.vmem [shape: f32[1,32], index: 1, kind: input, shape index: {}]   ;;  %s3080_s2 = inlined_call_operand.vmem [shape: f32[1,32], index: 2, kind: input, shape index: {}]   ;;  %s3081_s3 = inlined_call_operand.vmem [shape: f32[32,32], index: 3, kind: input, shape index: {}]   ;;  %s3082_s4 = inlined_call_operand.vmem [shape: f32[32,32], index: 4, kind: input, shape index: {}]   ;;  %s3083_s5 = inlined_call_operand.vmem [shape: f32[32,32], index: 5, kind: input, shape index: {}]   ;;  %s3084_s6 = inlined_call_operand.vmem [shape: f32[1,32], index: 6, kind: input, shape index: {}]   ;;  %s3085_s7 = inlined_call_operand.vmem [shape: f32[1,32], index: 7, kind: input, shape index: {}]   ;;  %s3086_s8 = inlined_call_operand.vmem [shape: f32[1,32], index: 8, kind: input, shape index: {}]   ;;  %s3087_s9 = inlined_call_operand.hbm [shape: f32[32,32], index: 9, kind: input, shape index: {}]   ;;  %s3088_s10 = inlined_call_operand.vmem [shape: f32[1,32], index: 10, kind: input, shape index: {}]   ;;  %s3089_s11 = inlined_call_operand.vmem [shape: f32[1,32], index: 11, kind: input, shape index: {}]   ;;  %s3090_s12 = inlined_call_operand.vmem [shape: f32[1,32], index: 12, kind: input, shape index: {}]   ;;  %s3091_s13 = inlined_call_operand.hbm [shape: f32[32,64], index: 13, kind: input, shape index: {}]   ;;  %s3092_s14 = inlined_call_operand.vmem [shape: f32[1,64], index: 14, kind: input, shape index: {}]   ;;  %s3093_s15 = inlined_call_operand.vmem [shape: f32[64,32], index: 15, kind: input, shape index: {}]   ;;  %s3094_s16 = inlined_call_operand.vmem [shape: f32[1,32], index: 16, kind: input, shape index: {}]   ;;  %s3095_s17 = inlined_call_operand.hbm [shape: f32[2,8,32], index: 17, kind: output, shape index: {}]  }
   0x1   :  { %3097 = sst [smem:[#allocation12_spill]] %s3078_s0 }
   0x2   :  { %3098 = sst [smem:[#allocation13_spill]] %s3079_s1 }
   0x3   :  { %22 = vsyncpa [#allocation3], 0 }
   0x4   :  { %23 = vsyncpa [#allocation6], 0 }
   0x5   :  { %24 = vsyncpa [#allocation4], 0  ;;  %s2649_s24 = smov [#allocation5]   ;;  %s2650_s26 = smov [#allocation2]  }
   0x6   :  { %s58_s25 = sshll.u32 %s2649_s24, 4  ;;  %s30_s27 = sshll.u32 %s2650_s26, 4  ;;  %s59_s25 = int_to_ptr.vmem [resolvable:$true] %s58_s25  ;;  %s2752_s27 = int_to_ptr.vmem [resolvable:$true] %s30_s27 }
   0x7   :  { %s2555_s0 = scalar_lea.hbm %s3087_s9, 512 }
   0x8   :  { %p2556_p0 = scmp.ne.s32.totalorder %s3087_s9, %s2555_s0  ;;  %p2559_p1 = scmp.lt.u32.totalorder %s2555_s0, %s3087_s9 }
   0xa   :  { %p2561_p2 = pnand %p2559_p1, %p2556_p0 }
   0xc   :  { %2564 = shalt.err (!%p2561_p2)
}
   0xd   :  { %s2565_s20 = scalar_lea.vmem %s59_s25, 512  ;;  %p2570_p4 = scmp.lt.s32.totalorder %s59_s25, %s59_s25 }
   0xe   :  { %p2566_p3 = scmp.ne.s32.totalorder %s59_s25, %s2565_s20  ;;  %p2571_p5 = scmp.lt.s32.totalorder %s2565_s20, %s2565_s20 }
  0x10   :  { %p2572_p6 = por %p2571_p5, %p2570_p4 }
  0x12   :  { %p2573_p7 = pnand %p2572_p6, %p2566_p3 }
  0x14   :  { %2576 = shalt.err (!%p2573_p7)
}
  0x15   :  { %s2651_s21 = smov 128   ;;  %s2652_s22 = smov 8  }
  0x16   :  { %64 = dma.hbm_to_vmem [thread:$0]  %s3087_s9, 512, %s59_s25, [#allocation6], %s2651_s21, %s2651_s21, %s2652_s22  }
  0x17   :  { %s3099_s29 = sld [smem:[#allocation12_spill]] }
  0x1d   :  { %s2577_s0 = scalar_lea.hbm %s3099_s29, 256 }
  0x1e   :  { %p2578_p8 = scmp.ne.s32.totalorder %s3099_s29, %s2577_s0  ;;  %p2581_p9 = scmp.lt.u32.totalorder %s2577_s0, %s3099_s29 }
  0x20   :  { %p2583_p10 = pnand %p2581_p9, %p2578_p8 }
  0x22   :  { %2586 = shalt.err (!%p2583_p10)
}
  0x23   :  { %s2587_s20 = scalar_lea.vmem %s2752_s27, 256  ;;  %p2592_p12 = scmp.lt.s32.totalorder %s2752_s27, %s2752_s27 }
  0x24   :  { %p2588_p11 = scmp.ne.s32.totalorder %s2752_s27, %s2587_s20  ;;  %p2593_p13 = scmp.lt.s32.totalorder %s2587_s20, %s2587_s20 }
  0x26   :  { %p2594_p0 = por %p2593_p13, %p2592_p12 }
  0x28   :  { %p2595_p1 = pnand %p2594_p0, %p2588_p11 }
  0x2a   :  { %2598 = shalt.err (!%p2595_p1)
}
  0x2b   :  { %36 = dma.hbm_to_vmem [thread:$0]  %s3099_s29, 256, %s2752_s27, [#allocation3], %s2651_s21, %s2651_s21, %s2652_s22  }
  0x2c   :  { %s2653_s23 = smov [#allocation7]   ;;  %s2599_s0 = scalar_lea.hbm %s3091_s13, 512 }
  0x2d   :  { %s76_s24 = sshll.u32 %s2653_s23, 4  ;;  %p2600_p2 = scmp.ne.s32.totalorder %s3091_s13, %s2599_s0  ;;  %s77_s24 = int_to_ptr.vmem [resolvable:$true] %s76_s24 }
  0x2e   :  { %p2603_p3 = scmp.lt.u32.totalorder %s2599_s0, %s3091_s13 }
  0x30   :  { %p2605_p4 = pnand %p2603_p3, %p2600_p2 }
  0x32   :  { %2608 = shalt.err (!%p2605_p4)
}
  0x33   :  { %s2609_s20 = scalar_lea.vmem %s77_s24, 512  ;;  %p2614_p6 = scmp.lt.s32.totalorder %s77_s24, %s77_s24 }
  0x34   :  { %p2610_p5 = scmp.ne.s32.totalorder %s77_s24, %s2609_s20  ;;  %p2615_p7 = scmp.lt.s32.totalorder %s2609_s20, %s2609_s20 }
  0x36   :  { %p2616_p8 = por %p2615_p7, %p2614_p6 }
  0x38   :  { %p2617_p9 = pnand %p2616_p8, %p2610_p5 }
  0x3a   :  { %2620 = shalt.err (!%p2617_p9)
}
  0x3b   :  { %82 = dma.hbm_to_vmem [thread:$0]  %s3091_s13, 512, %s77_s24, [#allocation6], %s2651_s21, %s2651_s21, %s2652_s22  }
  0x3c   :  { %2643 = dma.done.wait [#allocation3], 256  }
  0x3d   :  { %2644 = vsyncadd [#allocation3], 4294967040 }
  0x3e   :  { %2645 = dma.done.wait [#allocation6], 1024  }
  0x3f   :  { %2646 = vsyncadd [#allocation6], 4294966272  ;;  %vm102_vm0 = vcmask 261120   ;;  %v2804_v0 = vld [vmem:[#allocation2] sm:$0xff]  ;;  %v2806_v1 = vld [vmem:[#allocation2 + $0x8] sm:$0xff]  ;;  %s3100_s26 = sld [smem:[#allocation13_spill]] }
  0x40   :  { %v103_v2 = vsel %vm102_vm0, %v2804_v0, 0.0  ;;  %v106_v3 = vsel %vm102_vm0, %v2806_v1, 0.0  ;;  %v146_v14 = vld [vmem:[%s3081_s3] sm:$0xff]  ;;  %v147_v15 = vld [vmem:[%s3081_s3 + $0x8] sm:$0xff]  ;;  %v148_v19 = vld [vmem:[%s3081_s3 + $0x10] sm:$0xff]  ;;  %v2654_v48 = vmov 0.0  }
  0x41   :  { %104 = vadd.xlane.f32.xlu0 %v103_v2  ;;  %v324_v16 = vld [vmem:[%s3083_s5] sm:$0xff]  ;;  %v2438_v17 = vpack.c.bf16 %v147_v15, %v146_v14  ;;  %v325_v18 = vld [vmem:[%s3083_s5 + $0x8] sm:$0xff]  ;;  %v149_v20 = vld [vmem:[%s3081_s3 + $0x18] sm:$0xff]  ;;  %vm2655_vm1 = vmmov 0   ;;  %s2656_s20 = smov 120   ;;  %s2657_s27 = smov 112  }
  0x42   :  { %v2454_v21 = vpack.c.bf16 %v325_v18, %v324_v16  ;;  %v2442_v22 = vpack.c.bf16 %v149_v20, %v148_v19  ;;  %v326_v23 = vld [vmem:[%s3083_s5 + $0x10] sm:$0xff]  ;;  %v327_v24 = vld [vmem:[%s3083_s5 + $0x18] sm:$0xff]  ;;  %v238_v26 = vld [vmem:[%s3082_s4] sm:$0xff]  ;;  %vm458_vm2 = vcmask 64512   ;;  %s2660_s3 = smov 24   ;;  %vm1757_vm3 = vcmask 130048  }
  0x43   :  { %2439 = vmatprep.subr.bf16.mxu1 %v2438_v17  ;;  %v2458_v25 = vpack.c.bf16 %v327_v24, %v326_v23  ;;  %v239_v27 = vld [vmem:[%s3082_s4 + $0x8] sm:$0xff]  ;;  %v2167_v38 = vld [vmem:[%s3080_s2] ss:$0 sm:$0xff]  ;;  %v240_v43 = vld [vmem:[%s3082_s4 + $0x10] sm:$0xff]  ;;  %vm1760_vm4 = vcmask 195584   ;;  %vm2062_vm7 = vcmask 523264  }
  0x44   :  { %2441 = vmatpush3.bf16.msra.mxu1 %v2438_v17  ;;  %2455 = vmatprep.subr.bf16.mxu0 %v2454_v21  ;;  %v2446_v28 = vpack.c.bf16 %v239_v27, %v238_v26  ;;  %v241_v44 = vld [vmem:[%s3082_s4 + $0x18] sm:$0xff]  ;;  %v2168_v49 = vld [vmem:[%s3084_s6] ss:$0 sm:$0xff]  ;;  %s2658_s6 = smov 104  }
  0x45   :  { %107 = vadd.xlane.f32.xlu0 %v106_v3  ;;  %2457 = vmatpush3.bf16.msra.mxu0 %v2454_v21  ;;  %v2166_v36 = vld [vmem:[%s3100_s26] ss:$0 sm:$0xff]  ;;  %v2450_v47 = vpack.c.bf16 %v241_v44, %v240_v43 }
  0x46   :  { %2443 = vmatprep.subr.bf16.mxu1 %v2442_v22  ;;  %2459 = vmatprep.subr.bf16.mxu0 %v2458_v25  ;;  %v2171_v56 = vld [vmem:[%s3085_s7] ss:$0 sm:$0xff] }
  0x48   :  { %2445 = vmatpush3.bf16.msra.mxu1 %v2442_v22 }
  0x49   :  { %2461 = vmatpush3.bf16.msra.mxu0 %v2458_v25  ;;  %2447 = vmatprep.subr.bf16.mxu1 %v2446_v28 }
  0x4a   :  { %2327 = vmatprep.subr.mxu0 %v2654_v48 }
  0xce   :  { %v105_v4 = vpop.xlane.xlu0 %104 }
  0xcf   :  { %v110_v5 = vmul.f32 0.03125, %v105_v4 }
  0xd1   :  { %v112_v6 = vsub.f32 %v2804_v0, %v110_v5 }
  0xd2   :  { %v108_v7 = vpop.xlane.xlu0 %107 }
  0xd3   :  { %v111_v8 = vmul.f32 0.03125, %v108_v7  ;;  %v114_v9 = vmul.f32 %v112_v6, %v112_v6 }
  0xd5   :  { %v113_v10 = vsub.f32 %v2806_v1, %v111_v8  ;;  %v116_v11 = vsel %vm102_vm0, %v114_v9, 0.0  ;;  %v2174_v8 = vld [vmem:[%s3086_s8] ss:$0 sm:$0xff]  ;;  %s2659_s8 = smov 16  }
  0xd6   :  { %117 = vadd.xlane.f32.xlu1 %v116_v11 }
  0xd7   :  { %v115_v12 = vmul.f32 %v113_v10, %v113_v10 }
  0xd9   :  { %v119_v13 = vsel %vm102_vm0, %v115_v12, 0.0 }
  0xda   :  { %120 = vadd.xlane.f32.xlu1 %v119_v13 }
 0x163   :  { %v118_v29 = vpop.xlane.xlu1 %117 }
 0x164   :  { %v122_v30 = vmul.f32 0.03125, %v118_v29 }
 0x166   :  { %v124_v31 = vadd.f32 1e-05, %v122_v30 }
 0x167   :  { %v121_v32 = vpop.xlane.xlu1 %120 }
 0x168   :  { %2507 = vrsqrt.f32 %v124_v31  ;;  %v123_v33 = vmul.f32 0.03125, %v121_v32 }
 0x16a   :  { %v125_v34 = vadd.f32 1e-05, %v123_v33 }
 0x16c   :  { %2509 = vrsqrt.f32 %v125_v34 }
 0x172   :  { %v2508_v35 = vpop.eup %2507 }
 0x173   :  { %v128_v37 = vmul.f32 %v2508_v35, %v112_v6 }
 0x175   :  { %v136_v39 = vmul.f32 %v2166_v36, %v128_v37 }
 0x176   :  { %v2510_v40 = vpop.eup %2509 }
 0x177   :  { %v129_v41 = vmul.f32 %v2510_v40, %v113_v10  ;;  %v144_v42 = vadd.f32 %v2167_v38, %v136_v39 }
 0x179   :  { %v137_v45 = vmul.f32 %v2166_v36, %v129_v41  ;;  %2292 = vmatprep.mubr.msk.f32.mxu1 %vm102_vm0, %v144_v42  ;;  %2314 = vmatprep.mubr.msk.f32.mxu0 %vm102_vm0, %v144_v42 }
 0x17b   :  { %v145_v46 = vadd.f32 %v2167_v38, %v137_v45 }
 0x17d   :  { %2293 = vmatmul.mubr.msk.f32.vlgmr.msra.gmra.mrb[0].mxu1 %vm102_vm0, %v145_v46  ;;  %2315 = vmatmul.mubr.msk.f32.vlgmr.msra.gmra.mrb[0].mxu0 %vm102_vm0, %v145_v46 }
 0x17e   :  { %2449 = vmatpush3.bf16.msra.mxu1 %v2446_v28  ;;  %2303 = vmatprep.mubr.msk.f32.mxu1 %vm102_vm0, %v144_v42 }
 0x17f   :  { %2451 = vmatprep.subr.bf16.mxu1 %v2450_v47  ;;  %2329 = vmatprep.mubr.msk.f32.mxu0 %vm2655_vm1, %v2654_v48 }
 0x182   :  { %2453 = vmatpush3.bf16.msra.mxu1 %v2450_v47 }
 0x183   :  { %2317 = vmatprep.subr.mxu1 %v2654_v48 }
 0x185   :  { %2304 = vmatmul.mubr.msk.f32.vlgmr.msra.gmra.mrb[2].mxu1 %vm102_vm0, %v145_v46 }
 0x186   :  { %2319 = vmatprep.mubr.msk.f32.mxu1 %vm2655_vm1, %v2654_v48 }
 0x250   :  { %v2294_v50 = vpop.f32.mrb[0].mxu1  ;;  %v2873_v51 = vpop.f32.mrb[0].mxu0 }
 0x251   :  { %v235_v52 = vadd.f32 %v2294_v50, %v2168_v49  ;;  %v229_v53 = vpop.f32.mrb[1].mxu1  ;;  %v401_v54 = vpop.f32.mrb[1].mxu0  ;;  %v2934_v12 = vadd.f32 %v2873_v51, %v2174_v8 }
 0x252   :  { %v230_v55 = vadd.f32 %v2168_v49, %v229_v53  ;;  %v2923_v10 = vadd.f32 %v2174_v8, %v401_v54 }
 0x253   :  { %414 = vrot.lane.b32.xlu1 %v235_v52, %s2656_s20 }
 0x254   :  { %416 = vrot.lane.b32.xlu0 %v230_v55, %s2657_s27 }
 0x257   :  { %418 = vrot.lane.b32.xlu1 %v235_v52, %s2657_s27 }
 0x258   :  { %v2305_v57 = vpop.f32.mrb[2].mxu1 }
 0x259   :  { %v315_v58 = vpop.f32.mrb[3].mxu1  ;;  %v321_v60 = vadd.f32 %v2305_v57, %v2171_v56 }
 0x25a   :  { %v316_v59 = vadd.f32 %v2171_v56, %v315_v58 }
 0x25b   :  { %412 = vrot.lane.b32.xlu1 %v230_v55, %s2656_s20 }
 0x25c   :  { %2318 = vmatpush3.xpose.msk.msra.mxu1 %vm458_vm2, %v316_v59  ;;  %426 = vrot.lane.b32.xlu0 %v316_v59, %s2656_s20 }
 0x25d   :  { %2322 = vmatprep.subr.mxu1 %v2654_v48 }
 0x25f   :  { %2320 = vmatmul.mubr.msk.f32.vlgmr.msra.gmra.mrb[4].mxu1 %vm458_vm2, %v230_v55  ;;  %428 = vrot.lane.b32.xlu1 %v321_v60, %s2656_s20 }
 0x260   :  { %430 = vrot.lane.b32.xlu0 %v316_v59, %s2657_s27  ;;  %2323 = vmatpush3.xpose.msk.msra.mxu1 %vm458_vm2, %v321_v60 }
 0x261   :  { %2324 = vmatprep.mubr.msk.f32.mxu1 %vm2655_vm1, %v2654_v48  ;;  %2332 = vmatprep.subr.mxu1 %v2654_v48 }
 0x263   :  { %2325 = vmatmul.mubr.msk.f32.vlgmr.msra.gmra.mrb[6].mxu1 %vm458_vm2, %v235_v52  ;;  %432 = vrot.lane.b32.xlu1 %v321_v60, %s2657_s27 }
 0x264   :  { %434 = vrot.lane.b32.xlu0 %v316_v59, %s2658_s6  ;;  %2334 = vmatprep.mubr.msk.f32.mxu1 %vm2655_vm1, %v2654_v48 }
 0x267   :  { %436 = vrot.lane.b32.xlu1 %v321_v60, %s2658_s6 }
 0x268   :  { %420 = vrot.lane.b32.xlu0 %v230_v55, %s2658_s6 }
 0x26b   :  { %422 = vrot.lane.b32.xlu1 %v235_v52, %s2658_s6 }
 0x2c5   :  { %v415_v61 = vpop.permute.xlu1 %414 }
 0x2c6   :  { %v417_v63 = vpop.permute.xlu0 %416 }
 0x2c9   :  { %v419_v62 = vpop.permute.xlu1 %418 }
 0x2cd   :  { %v413_v2 = vpop.permute.xlu1 %412 }
 0x2ce   :  { %v427_v3 = vpop.permute.xlu0 %426 }
 0x2cf   :  { %2328 = vmatpush3.xpose.msk.msra.mxu0 %vm458_vm2, %v427_v3 }
 0x2d0   :  { %2337 = vmatprep.subr.mxu0 %v2654_v48 }
 0x2d1   :  { %v429_v4 = vpop.permute.xlu1 %428 }
 0x2d2   :  { %v431_v5 = vpop.permute.xlu0 %430  ;;  %2330 = vmatmul.mubr.msk.f32.vlgmr.msra.gmra.mrb[2].mxu0 %vm458_vm2, %v413_v2  ;;  %2333 = vmatpush3.xpose.msk.msra.mxu1 %vm458_vm2, %v429_v4 }
 0x2d3   :  { %2338 = vmatpush3.xpose.msk.msra.mxu0 %vm458_vm2, %v431_v5  ;;  %2339 = vmatprep.mubr.msk.f32.mxu0 %vm2655_vm1, %v2654_v48 }
 0x2d4   :  { %2347 = vmatprep.subr.mxu0 %v2654_v48  ;;  %2342 = vmatprep.subr.mxu1 %v2654_v48 }
 0x2d5   :  { %v433_v6 = vpop.permute.xlu1 %432  ;;  %2335 = vmatmul.mubr.msk.f32.vlgmr.msra.gmra.mrb[8].mxu1 %vm458_vm2, %v415_v61 }
 0x2d6   :  { %v435_v7 = vpop.permute.xlu0 %434  ;;  %2340 = vmatmul.mubr.msk.f32.vlgmr.msra.gmra.mrb[4].mxu0 %vm458_vm2, %v417_v63  ;;  %2343 = vmatpush3.xpose.msk.msra.mxu1 %vm458_vm2, %v433_v6 }
 0x2d7   :  { %2348 = vmatpush3.xpose.msk.msra.mxu0 %vm458_vm2, %v435_v7  ;;  %2344 = vmatprep.mubr.msk.f32.mxu1 %vm2655_vm1, %v2654_v48 }
 0x2d8   :  { %2349 = vmatprep.mubr.msk.f32.mxu0 %vm2655_vm1, %v2654_v48  ;;  %2357 = vmatprep.subr.mxu0 %v2654_v48 }
 0x2d9   :  { %v437_v9 = vpop.permute.xlu1 %436  ;;  %2345 = vmatmul.mubr.msk.f32.vlgmr.msra.gmra.mrb[10].mxu1 %vm458_vm2, %v419_v62  ;;  %2352 = vmatprep.subr.mxu1 %v2654_v48 }
 0x2da   :  { %v421_v11 = vpop.permute.xlu0 %420  ;;  %2353 = vmatpush3.xpose.msk.msra.mxu1 %vm458_vm2, %v437_v9  ;;  %2354 = vmatprep.mubr.msk.f32.mxu1 %vm2655_vm1, %v2654_v48 }
 0x2db   :  { %2350 = vmatmul.mubr.msk.f32.vlgmr.msra.gmra.mrb[6].mxu0 %vm458_vm2, %v421_v11  ;;  %2362 = vmatprep.subr.mxu1 %v2654_v48 }
 0x2dc   :  { %2358 = vmatpush3.msra.mxu0 %v2923_v10  ;;  %2359 = vmatprep.mubr.msk.f32.mxu0 %vm2655_vm1, %v2654_v48 }
 0x2dd   :  { %v423_v13 = vpop.permute.xlu1 %422  ;;  %2367 = vmatprep.subr.mxu0 %v2654_v48 }
 0x2de   :  { %2355 = vmatmul.mubr.msk.f32.vlgmr.msra.gmra.mrb[12].mxu1 %vm458_vm2, %v423_v13 }
 0x2df   :  { %2363 = vmatpush3.msra.mxu1 %v2934_v12  ;;  %2364 = vmatprep.mubr.msk.f32.mxu1 %vm2655_vm1, %v2654_v48 }
 0x2e0   :  { %2372 = vmatprep.subr.mxu1 %v2654_v48 }
 0x332   :  { %v529_v14 = vpop.f32.mrb[4].mxu1 }
 0x333   :  { %v1051_v15 = vmul.f32 0.35355338, %v529_v14  ;;  %v2321_v16 = vpop.f32.mrb[5].mxu1 }
 0x335   :  { %v1059_v17 = vsel %vm458_vm2, %v1051_v15, -inf }
 0x336   :  { %1060 = vmax.xlane.f32.xlu0 %v1059_v17  ;;  %v603_v18 = vpop.f32.mrb[6].mxu1 }
 0x337   :  { %v1052_v19 = vmul.f32 0.35355338, %v603_v18  ;;  %v2326_v20 = vpop.f32.mrb[7].mxu1 }
 0x339   :  { %v1062_v21 = vsel %vm458_vm2, %v1052_v19, -inf }
 0x33a   :  { %1063 = vmax.xlane.f32.xlu1 %v1062_v21 }
 0x3a5   :  { %v677_v22 = vpop.f32.mrb[2].mxu0 }
 0x3a6   :  { %v2331_v23 = vpop.f32.mrb[3].mxu0  ;;  %v1053_v29 = vmul.f32 0.35355338, %v677_v22 }
 0x3a8   :  { %v751_v24 = vpop.f32.mrb[8].mxu1  ;;  %v1065_v37 = vsel %vm458_vm2, %v1053_v29, -inf }
 0x3a9   :  { %v1054_v25 = vmul.f32 0.35355338, %v751_v24  ;;  %v825_v26 = vpop.f32.mrb[4].mxu0  ;;  %v2336_v27 = vpop.f32.mrb[9].mxu1 }
 0x3aa   :  { %v2341_v28 = vpop.f32.mrb[5].mxu0  ;;  %v1055_v35 = vmul.f32 0.35355338, %v825_v26 }
 0x3ab   :  { %v1068_v30 = vsel %vm458_vm2, %v1054_v25, -inf }
 0x3ac   :  { %1069 = vmax.xlane.f32.xlu0 %v1068_v30  ;;  %v899_v31 = vpop.f32.mrb[10].mxu1  ;;  %v1071_v43 = vsel %vm458_vm2, %v1055_v35, -inf }
 0x3ad   :  { %v1056_v32 = vmul.f32 0.35355338, %v899_v31  ;;  %v2346_v33 = vpop.f32.mrb[11].mxu1 }
 0x3ae   :  { %v973_v34 = vpop.f32.mrb[6].mxu0 }
 0x3af   :  { %v2351_v36 = vpop.f32.mrb[7].mxu0  ;;  %v1074_v38 = vsel %vm458_vm2, %v1056_v32, -inf  ;;  %v1057_v42 = vmul.f32 0.35355338, %v973_v34 }
 0x3b0   :  { %1066 = vmax.xlane.f32.xlu0 %v1065_v37  ;;  %1075 = vmax.xlane.f32.xlu1 %v1074_v38 }
 0x3b1   :  { %v1047_v39 = vpop.f32.mrb[12].mxu1  ;;  %v1077_v45 = vsel %vm458_vm2, %v1057_v42, -inf }
 0x3b2   :  { %v1058_v40 = vmul.f32 0.35355338, %v1047_v39  ;;  %v2356_v41 = vpop.f32.mrb[13].mxu1 }
 0x3b4   :  { %1072 = vmax.xlane.f32.xlu0 %v1071_v43  ;;  %v1080_v44 = vsel %vm458_vm2, %v1058_v40, -inf }
 0x3b5   :  { %1081 = vmax.xlane.f32.xlu1 %v1080_v44 }
 0x3b8   :  { %1078 = vmax.xlane.f32.xlu0 %v1077_v45 }
 0x3c3   :  { %v1061_v46 = vpop.xlane.xlu0 %1060 }
 0x3c4   :  { %v1083_v47 = vsub.f32 %v1051_v15, %v1061_v46 }
 0x3c6   :  { %442 = vrot.lane.b32.xlu1 %v2934_v12, %s2656_s20  ;;  %v1091_v50 = vmul.f32 1.442695, %v1083_v47 }
 0x3c7   :  { %v1064_v49 = vpop.xlane.xlu1 %1063 }
 0x3c8   :  { %v1084_v51 = vsub.f32 %v1052_v19, %v1064_v49  ;;  %2511 = vpow2.f32 %v1091_v50 }
 0x3ca   :  { %446 = vrot.lane.b32.xlu1 %v2923_v10, %s2657_s27  ;;  %v1093_v52 = vmul.f32 1.442695, %v1084_v51 }
 0x3cc   :  { %2513 = vpow2.f32 %v1093_v52 }
 0x3ce   :  { %440 = vrot.lane.b32.xlu0 %v2923_v10, %s2656_s20  ;;  %448 = vrot.lane.b32.xlu1 %v2934_v12, %s2657_s27 }
 0x3d2   :  { %v2512_v53 = vpop.eup %2511 }
 0x3d3   :  { %v1107_v54 = vsel %vm458_vm2, %v2512_v53, 0.0 }
 0x3d6   :  { %v2514_v55 = vpop.eup %2513 }
 0x3d7   :  { %v1110_v56 = vsel %vm458_vm2, %v2514_v55, 0.0 }
 0x3ed   :  { %1108 = vadd.xlane.f32.xlu0 %v1107_v54 }
 0x3f2   :  { %1111 = vadd.xlane.f32.xlu1 %v1110_v56 }
 0x439   :  { %v1070_v57 = vpop.xlane.xlu0 %1069 }
 0x43a   :  { %v1086_v58 = vsub.f32 %v1054_v25, %v1070_v57 }
 0x43c   :  { %v1097_v59 = vmul.f32 1.442695, %v1086_v58 }
 0x43d   :  { %v1067_v60 = vpop.xlane.xlu0 %1066  ;;  %v1076_v61 = vpop.xlane.xlu1 %1075 }
 0x43e   :  { %2515 = vpow2.f32 %v1097_v59  ;;  %v1085_v62 = vsub.f32 %v1053_v29, %v1067_v60  ;;  %v1088_v63 = vsub.f32 %v1056_v32, %v1076_v61  ;;  %v1763_v60 = vld [vmem:[#allocation5] sm:$0xff]  ;;  %v1764_v61 = vld [vmem:[#allocation5 + $0x8] sm:$0xff] }
 0x440   :  { %v1095_v2 = vmul.f32 1.442695, %v1085_v62  ;;  %v1101_v3 = vmul.f32 1.442695, %v1088_v63  ;;  %v2462_v62 = vpack.c.bf16 %v1764_v61, %v1763_v60  ;;  %v1765_v63 = vld [vmem:[#allocation5 + $0x10] sm:$0xff] }
 0x441   :  { %v1073_v4 = vpop.xlane.xlu0 %1072  ;;  %v2205_v60 = vld [vmem:[%s3090_s12] ss:$0 sm:$0xff] }
 0x442   :  { %2517 = vpow2.f32 %v1095_v2  ;;  %v1087_v5 = vsub.f32 %v1055_v35, %v1073_v4  ;;  %v1082_v6 = vpop.xlane.xlu1 %1081  ;;  %v1766_v2 = vld [vmem:[#allocation5 + $0x18] sm:$0xff] }
 0x443   :  { %2519 = vpow2.f32 %v1101_v3  ;;  %v1090_v7 = vsub.f32 %v1058_v40, %v1082_v6  ;;  %v2466_v3 = vpack.c.bf16 %v1766_v2, %v1765_v63 }
 0x444   :  { %v1099_v8 = vmul.f32 1.442695, %v1087_v5 }
 0x445   :  { %v1105_v9 = vmul.f32 1.442695, %v1090_v7  ;;  %v1079_v11 = vpop.xlane.xlu0 %1078 }
 0x446   :  { %2521 = vpow2.f32 %v1099_v8  ;;  %v1089_v13 = vsub.f32 %v1057_v42, %v1079_v11  ;;  %v443_v27 = vpop.permute.xlu1 %442 }
 0x447   :  { %2523 = vpow2.f32 %v1105_v9 }
 0x448   :  { %v2516_v14 = vpop.eup %2515  ;;  %v1103_v15 = vmul.f32 1.442695, %v1089_v13 }
 0x449   :  { %v1116_v16 = vsel %vm458_vm2, %v2516_v14, 0.0  ;;  %v441_v29 = vpop.permute.xlu0 %440 }
 0x44a   :  { %2525 = vpow2.f32 %v1103_v15  ;;  %1117 = vadd.xlane.f32.xlu1 %v1116_v16  ;;  %v447_v28 = vpop.permute.xlu1 %446 }
 0x44c   :  { %v2518_v17 = vpop.eup %2517 }
 0x44d   :  { %v2520_v18 = vpop.eup %2519  ;;  %v1113_v19 = vsel %vm458_vm2, %v2518_v17, 0.0 }
 0x44e   :  { %1114 = vadd.xlane.f32.xlu0 %v1113_v19  ;;  %v1122_v20 = vsel %vm458_vm2, %v2520_v18, 0.0  ;;  %v449_v31 = vpop.permute.xlu1 %448 }
 0x44f   :  { %1123 = vadd.xlane.f32.xlu1 %v1122_v20 }
 0x450   :  { %v2522_v21 = vpop.eup %2521 }
 0x451   :  { %v2524_v22 = vpop.eup %2523  ;;  %v1119_v23 = vsel %vm458_vm2, %v2522_v21, 0.0 }
 0x452   :  { %1120 = vadd.xlane.f32.xlu0 %v1119_v23  ;;  %v1128_v24 = vsel %vm458_vm2, %v2524_v22, 0.0 }
 0x453   :  { %1129 = vadd.xlane.f32.xlu1 %v1128_v24 }
 0x454   :  { %v2965_v25 = vpop.eup %2525 }
 0x455   :  { %v1125_v26 = vsel %vm458_vm2, %v2965_v25, 0.0 }
 0x456   :  { %1126 = vadd.xlane.f32.xlu0 %v1125_v26 }
 0x464   :  { %454 = vrot.lane.b32.xlu1 %v2934_v12, %s2658_s6 }
 0x46c   :  { %452 = vrot.lane.b32.xlu0 %v2923_v10, %s2658_s6 }
 0x47a   :  { %v1109_v30 = vpop.xlane.xlu0 %1108 }
 0x47b   :  { %2527 = vrcp.f32 %v1109_v30 }
 0x47f   :  { %v1112_v32 = vpop.xlane.xlu1 %1111 }
 0x480   :  { %2529 = vrcp.f32 %v1112_v32 }
 0x485   :  { %v2528_v33 = vpop.eup %2527 }
 0x486   :  { %v1132_v34 = vmul.f32 %v2528_v33, %v2512_v53 }
 0x488   :  { %2360 = vmatmul.mubr.msk.f32.vlgmr.msra.gmra.mrb[8].mxu0 %vm458_vm2, %v1132_v34 }
 0x489   :  { %2368 = vmatpush3.msra.mxu0 %v441_v29  ;;  %2369 = vmatprep.mubr.msk.f32.mxu0 %vm2655_vm1, %v2654_v48  ;;  %v2201_v29 = vld [vmem:[%s3088_s10] ss:$0 sm:$0xff] }
 0x48a   :  { %v2530_v12 = vpop.eup %2529  ;;  %2377 = vmatprep.subr.mxu0 %v2654_v48 }
 0x48b   :  { %v1134_v10 = vmul.f32 %v2530_v12, %v2514_v55 }
 0x48d   :  { %2365 = vmatmul.mubr.msk.f32.vlgmr.msra.gmra.mrb[14].mxu1 %vm458_vm2, %v1134_v10 }
 0x48e   :  { %2373 = vmatpush3.msra.mxu1 %v443_v27  ;;  %2374 = vmatprep.mubr.msk.f32.mxu1 %vm2655_vm1, %v2654_v48 }
 0x48f   :  { %2382 = vmatprep.subr.mxu1 %v2654_v48 }
 0x4d7   :  { %v1118_v35 = vpop.xlane.xlu1 %1117 }
 0x4d8   :  { %2531 = vrcp.f32 %v1118_v35 }
 0x4db   :  { %v1115_v36 = vpop.xlane.xlu0 %1114 }
 0x4dc   :  { %2533 = vrcp.f32 %v1115_v36  ;;  %v1124_v37 = vpop.xlane.xlu1 %1123 }
 0x4dd   :  { %2535 = vrcp.f32 %v1124_v37 }
 0x4df   :  { %v1121_v38 = vpop.xlane.xlu0 %1120 }
 0x4e0   :  { %2537 = vrcp.f32 %v1121_v38  ;;  %v1130_v39 = vpop.xlane.xlu1 %1129 }
 0x4e1   :  { %2539 = vrcp.f32 %v1130_v39 }
 0x4e2   :  { %v2532_v40 = vpop.eup %2531 }
 0x4e3   :  { %v1138_v41 = vmul.f32 %v2532_v40, %v2516_v14  ;;  %v1127_v42 = vpop.xlane.xlu0 %1126 }
 0x4e4   :  { %2541 = vrcp.f32 %v1127_v42  ;;  %v455_v49 = vpop.permute.xlu1 %454 }
 0x4e5   :  { %2375 = vmatmul.mubr.msk.f32.vlgmr.msra.gmra.mrb[16].mxu1 %vm458_vm2, %v1138_v41 }
 0x4e6   :  { %v2534_v43 = vpop.eup %2533  ;;  %2383 = vmatpush3.msra.mxu1 %v449_v31  ;;  %2384 = vmatprep.mubr.msk.f32.mxu1 %vm2655_vm1, %v2654_v48 }
 0x4e7   :  { %v2536_v44 = vpop.eup %2535  ;;  %v1136_v45 = vmul.f32 %v2534_v43, %v2518_v17  ;;  %2392 = vmatprep.subr.mxu1 %v2654_v48  ;;  %v453_v53 = vpop.permute.xlu0 %452 }
 0x4e8   :  { %v1142_v46 = vmul.f32 %v2536_v44, %v2520_v18  ;;  %v1901_v44 = vld [vmem:[#allocation7] sm:$0xff] }
 0x4e9   :  { %2370 = vmatmul.mubr.msk.f32.vlgmr.msra.gmra.mrb[10].mxu0 %vm458_vm2, %v1136_v45  ;;  %v1902_v45 = vld [vmem:[#allocation7 + $0x8] sm:$0xff] }
 0x4ea   :  { %v2538_v47 = vpop.eup %2537  ;;  %2378 = vmatpush3.msra.mxu0 %v447_v28  ;;  %2385 = vmatmul.mubr.msk.f32.vlgmr.msra.gmra.mrb[18].mxu1 %vm458_vm2, %v1142_v46  ;;  %v2470_v46 = vpack.c.bf16 %v1902_v45, %v1901_v44 }
 0x4eb   :  { %v2540_v50 = vpop.eup %2539  ;;  %v1140_v51 = vmul.f32 %v2538_v47, %v2522_v21  ;;  %2393 = vmatpush3.msra.mxu1 %v455_v49  ;;  %2379 = vmatprep.mubr.msk.f32.mxu0 %vm2655_vm1, %v2654_v48  ;;  %v1903_v47 = vld [vmem:[#allocation7 + $0x10] sm:$0xff]  ;;  %v1904_v49 = vld [vmem:[#allocation7 + $0x18] sm:$0xff] }
 0x4ec   :  { %v1146_v52 = vmul.f32 %v2540_v50, %v2524_v22  ;;  %2387 = vmatprep.subr.mxu0 %v2654_v48  ;;  %2394 = vmatprep.mubr.msk.f32.mxu1 %vm2655_vm1, %v2654_v48  ;;  %v2474_v50 = vpack.c.bf16 %v1904_v49, %v1903_v47 }
 0x4ed   :  { %2380 = vmatmul.mubr.msk.f32.vlgmr.msra.gmra.mrb[12].mxu0 %vm458_vm2, %v1140_v51  ;;  %2471 = vmatprep.subr.bf16.mxu1 %v2470_v46 }
 0x4ee   :  { %v2542_v54 = vpop.eup %2541  ;;  %2388 = vmatpush3.msra.mxu0 %v453_v53  ;;  %2395 = vmatmul.mubr.msk.f32.vlgmr.msra.gmra.mrb[20].mxu1 %vm458_vm2, %v1146_v52 }
 0x4ef   :  { %v1144_v55 = vmul.f32 %v2542_v54, %v2965_v25  ;;  %2389 = vmatprep.mubr.msk.f32.mxu0 %vm2655_vm1, %v2654_v48  ;;  %2463 = vmatprep.subr.bf16.mxu0 %v2462_v62 }
 0x4f0   :  { %2473 = vmatpush3.bf16.msra.mxu1 %v2470_v46 }
 0x4f1   :  { %2390 = vmatmul.mubr.msk.f32.vlgmr.msra.gmra.mrb[14].mxu0 %vm458_vm2, %v1144_v55  ;;  %2475 = vmatprep.subr.bf16.mxu1 %v2474_v50 }
 0x4f2   :  { %2465 = vmatpush3.bf16.msra.mxu0 %v2462_v62 }
 0x4f3   :  { %2467 = vmatprep.subr.bf16.mxu0 %v2466_v3 }
 0x4f4   :  { %2477 = vmatpush3.bf16.msra.mxu1 %v2474_v50 }
 0x4f6   :  { %2469 = vmatpush3.bf16.msra.mxu0 %v2466_v3 }
 0x55b   :  { %v1216_v56 = vpop.f32.mrb[8].mxu0 }
 0x55c   :  { %v2361_v57 = vpop.f32.mrb[9].mxu0 }
 0x560   :  { %v1289_v58 = vpop.f32.mrb[14].mxu1 }
 0x561   :  { %v2366_v59 = vpop.f32.mrb[15].mxu1 }
 0x5b8   :  { %v1435_v4 = vpop.f32.mrb[16].mxu1 }
 0x5b9   :  { %1735 = vrot.lane.b32.xlu1 %v1435_v4, %s2652_s22  ;;  %v2376_v5 = vpop.f32.mrb[17].mxu1 }
 0x5ba   :  { %v2047_v5 = vld [vmem:[%s3093_s15] sm:$0xff] }
 0x5bc   :  { %v1362_v48 = vpop.f32.mrb[10].mxu0 }
 0x5bd   :  { %v1581_v6 = vpop.f32.mrb[18].mxu1  ;;  %1733 = vrot.lane.b32.xlu0 %v1362_v48, %s2652_s22  ;;  %v2371_v7 = vpop.f32.mrb[11].mxu0  ;;  %v2048_v48 = vld [vmem:[%s3093_s15 + $0x8] sm:$0xff] }
 0x5be   :  { %1743 = vrot.lane.b32.xlu1 %v1581_v6, %s2659_s8  ;;  %v2386_v8 = vpop.f32.mrb[19].mxu1  ;;  %v2478_v6 = vpack.c.bf16 %v2048_v48, %v2047_v5  ;;  %v2049_v7 = vld [vmem:[%s3093_s15 + $0x10] sm:$0xff] }
 0x5bf   :  { %v2050_v8 = vld [vmem:[%s3093_s15 + $0x18] sm:$0xff] }
 0x5c0   :  { %v1508_v9 = vpop.f32.mrb[12].mxu0  ;;  %2479 = vmatprep.subr.bf16.mxu0 %v2478_v6 }
 0x5c1   :  { %1741 = vrot.lane.b32.xlu0 %v1508_v9, %s2659_s8  ;;  %v2381_v11 = vpop.f32.mrb[13].mxu0  ;;  %v1727_v13 = vpop.f32.mrb[20].mxu1  ;;  %v2482_v9 = vpack.c.bf16 %v2050_v8, %v2049_v7 }
 0x5c2   :  { %1751 = vrot.lane.b32.xlu1 %v1727_v13, %s2660_s3  ;;  %v2396_v14 = vpop.f32.mrb[21].mxu1  ;;  %v2051_v11 = vld [vmem:[%s3093_s15 + $0x20] sm:$0xff]  ;;  %v2052_v13 = vld [vmem:[%s3093_s15 + $0x28] sm:$0xff] }
 0x5c3   :  { %v2486_v14 = vpack.c.bf16 %v2052_v13, %v2051_v11 }
 0x5c4   :  { %v1654_v15 = vpop.f32.mrb[14].mxu0 }
 0x5c5   :  { %1749 = vrot.lane.b32.xlu0 %v1654_v15, %s2660_s3  ;;  %v2391_v16 = vpop.f32.mrb[15].mxu0  ;;  %v2053_v15 = vld [vmem:[%s3093_s15 + $0x30] sm:$0xff]  ;;  %s2661_s3 = smov [#allocation8]  }
 0x5c6   :  { %v2054_v16 = vld [vmem:[%s3093_s15 + $0x38] sm:$0xff]  ;;  %s2153_s25 = sshll.u32 %s2661_s3, 4  ;;  %s2154_s25 = int_to_ptr.vmem [resolvable:$true] %s2153_s25 }
 0x5c7   :  { %s2621_s23 = scalar_lea.vmem %s2154_s25, 256  ;;  %p2626_p11 = scmp.lt.s32.totalorder %s2154_s25, %s2154_s25 }
 0x5c8   :  { %p2622_p10 = scmp.ne.s32.totalorder %s2154_s25, %s2621_s23  ;;  %p2627_p12 = scmp.lt.s32.totalorder %s2621_s23, %s2621_s23 }
 0x5ca   :  { %p2628_p13 = por %p2627_p12, %p2626_p11 }
 0x5cc   :  { %p2629_p0 = pnand %p2628_p13, %p2622_p10 }
 0x62b   :  { %v1736_v17 = vpop.permute.xlu1 %1735 }
 0x62c   :  { %v1756_v23 = vsel %vm458_vm2, %v1289_v58, %v1736_v17  ;;  %v2204_v58 = vld [vmem:[%s3089_s11] ss:$0 sm:$0xff]  ;;  %v2490_v17 = vpack.c.bf16 %v2054_v16, %v2053_v15 }
 0x62f   :  { %v1734_v18 = vpop.permute.xlu0 %1733 }
 0x630   :  { %v1744_v19 = vpop.permute.xlu1 %1743  ;;  %v1755_v21 = vsel %vm458_vm2, %v1216_v56, %v1734_v18  ;;  %v2206_v18 = vld [vmem:[%s3092_s14] ss:$0 sm:$0xff] }
 0x631   :  { %v1759_v26 = vsel %vm1757_vm3, %v1756_v23, %v1744_v19 }
 0x633   :  { %v1742_v20 = vpop.permute.xlu0 %1741 }
 0x634   :  { %v1752_v22 = vpop.permute.xlu1 %1751  ;;  %v1758_v24 = vsel %vm1757_vm3, %v1755_v21, %v1742_v20 }
 0x635   :  { %v1762_v28 = vsel %vm1760_vm4, %v1759_v26, %v1752_v22 }
 0x637   :  { %v1750_v25 = vpop.permute.xlu0 %1749 }
 0x638   :  { %v1761_v27 = vsel %vm1760_vm4, %v1758_v24, %v1750_v25 }
 0x639   :  { %2405 = vmatprep.mubr.msk.f32.mxu0 %vm102_vm0, %v1761_v27 }
 0x63a   :  { %2406 = vmatmul.mubr.msk.f32.vlgmr.msra.gmra.mrb[16].mxu0 %vm102_vm0, %v1762_v28 }
 0x63b   :  { %2481 = vmatpush3.bf16.msra.mxu0 %v2478_v6 }
 0x63c   :  { %2483 = vmatprep.subr.bf16.mxu0 %v2482_v9 }
 0x63f   :  { %2485 = vmatpush3.bf16.msra.mxu0 %v2482_v9  ;;  %v2209_v9 = vld [vmem:[%s3094_s16] ss:$0 sm:$0xff] }
 0x640   :  { %2487 = vmatprep.subr.bf16.mxu0 %v2486_v14 }
 0x643   :  { %2489 = vmatpush3.bf16.msra.mxu0 %v2486_v14 }
 0x644   :  { %2491 = vmatprep.subr.bf16.mxu0 %v2490_v17 }
 0x647   :  { %2493 = vmatpush3.bf16.msra.mxu0 %v2490_v17 }
 0x70d   :  { %v2407_v30 = vpop.f32.mrb[16].mxu0 }
 0x70e   :  { %v1852_v31 = vadd.f32 %v2407_v30, %v2201_v29  ;;  %v1846_v32 = vpop.f32.mrb[17].mxu0 }
 0x70f   :  { %v1847_v33 = vadd.f32 %v2201_v29, %v1846_v32 }
 0x710   :  { %v3008_v34 = vadd.f32 %v1852_v31, %v2806_v1 }
 0x711   :  { %v3011_v12 = vadd.f32 %v1847_v33, %v2804_v0 }
 0x712   :  { %v1862_v10 = vsel %vm102_vm0, %v3008_v34, 0.0 }
 0x713   :  { %1863 = vadd.xlane.f32.xlu1 %v1862_v10  ;;  %v1859_v35 = vsel %vm102_vm0, %v3011_v12, 0.0 }
 0x714   :  { %1860 = vadd.xlane.f32.xlu0 %v1859_v35 }
 0x7a0   :  { %v1864_v36 = vpop.xlane.xlu1 %1863 }
 0x7a1   :  { %v1866_v37 = vmul.f32 0.03125, %v1864_v36  ;;  %v1861_v38 = vpop.xlane.xlu0 %1860 }
 0x7a2   :  { %v1865_v39 = vmul.f32 0.03125, %v1861_v38 }
 0x7a3   :  { %v1868_v40 = vsub.f32 %v3008_v34, %v1866_v37 }
 0x7a4   :  { %v1867_v1 = vsub.f32 %v3011_v12, %v1865_v39 }
 0x7a5   :  { %v1870_v42 = vmul.f32 %v1868_v40, %v1868_v40 }
 0x7a6   :  { %v1869_v41 = vmul.f32 %v1867_v1, %v1867_v1 }
 0x7a7   :  { %v1874_v43 = vsel %vm102_vm0, %v1870_v42, 0.0 }
 0x7a8   :  { %v1871_v0 = vsel %vm102_vm0, %v1869_v41, 0.0 }
 0x7a9   :  { %1872 = vadd.xlane.f32.xlu0 %v1871_v0 }
 0x7ad   :  { %1875 = vadd.xlane.f32.xlu0 %v1874_v43 }
 0x836   :  { %v1873_v51 = vpop.xlane.xlu0 %1872 }
 0x837   :  { %v1877_v52 = vmul.f32 0.03125, %v1873_v51 }
 0x839   :  { %v1879_v53 = vadd.f32 1e-05, %v1877_v52 }
 0x83a   :  { %v1876_v54 = vpop.xlane.xlu0 %1875 }
 0x83b   :  { %2543 = vrsqrt.f32 %v1879_v53  ;;  %v1878_v55 = vmul.f32 0.03125, %v1876_v54 }
 0x83d   :  { %v1880_v56 = vadd.f32 1e-05, %v1878_v55 }
 0x83f   :  { %2545 = vrsqrt.f32 %v1880_v56 }
 0x845   :  { %v2544_v57 = vpop.eup %2543 }
 0x846   :  { %v1883_v59 = vmul.f32 %v2544_v57, %v1867_v1 }
 0x848   :  { %v1891_v61 = vmul.f32 %v2204_v58, %v1883_v59 }
 0x849   :  { %v2546_v62 = vpop.eup %2545 }
 0x84a   :  { %v1884_v63 = vmul.f32 %v2546_v62, %v1868_v40  ;;  %v1899_v2 = vadd.f32 %v2205_v60, %v1891_v61 }
 0x84c   :  { %v1892_v3 = vmul.f32 %v2204_v58, %v1884_v63  ;;  %2416 = vmatprep.mubr.msk.f32.mxu1 %vm102_vm0, %v1899_v2 }
 0x84e   :  { %v1900_v4 = vadd.f32 %v2205_v60, %v1892_v3 }
 0x850   :  { %2417 = vmatmul.mubr.msk.f32.vlgmr.msra.gmra.mrb[22].mxu1 %vm102_vm0, %v1900_v4 }
 0x923   :  { %v2418_v19 = vpop.f32.mrb[22].mxu1 }
 0x924   :  { %v1990_v20 = vadd.f32 %v2418_v19, %v2206_v18  ;;  %v1984_v21 = vpop.f32.mrb[23].mxu1 }
 0x925   :  { %v1985_v22 = vadd.f32 %v2206_v18, %v1984_v21 }
 0x926   :  { %v1996_v23 = vmul.f32 0.70710677, %v1990_v20  ;;  %v1994_v6 = vmul.f32 0.5, %v1990_v20 }
 0x927   :  { %v1995_v24 = vmul.f32 0.70710677, %v1985_v22  ;;  %v1993_v5 = vmul.f32 0.5, %v1985_v22 }
 0x928   :  { %v1998_v25 = vand.u32 2147483647, %v1996_v23  ;;  %vm2038_vm5 = vcmp.ge.f32.partialorder %v1996_v23, 0.0 }
 0x929   :  { %v1997_v26 = vand.u32 2147483647, %v1995_v24  ;;  %vm2037_vm6 = vcmp.ge.f32.partialorder %v1995_v24, 0.0 }
 0x92a   :  { %v2000_v27 = vmul.f32 0.3275911, %v1998_v25  ;;  %v2026_v31 = vsub.f32 0.0, %v1998_v25 }
 0x92b   :  { %v1999_v28 = vmul.f32 0.3275911, %v1997_v26  ;;  %v2025_v32 = vsub.f32 0.0, %v1997_v26 }
 0x92c   :  { %v2002_v29 = vadd.f32 1.0, %v2000_v27  ;;  %v2028_v10 = vmul.f32 %v2026_v31, %v1998_v25 }
 0x92d   :  { %v2001_v30 = vadd.f32 1.0, %v1999_v28  ;;  %v2027_v37 = vmul.f32 %v2025_v32, %v1997_v26 }
 0x92e   :  { %2547 = vrcp.f32 %v2002_v29  ;;  %v2031_v40 = vmul.f32 1.442695, %v2028_v10 }
 0x92f   :  { %2549 = vrcp.f32 %v2001_v30  ;;  %v2029_v0 = vmul.f32 1.442695, %v2027_v37 }
 0x930   :  { %2551 = vpow2.f32 %v2031_v40 }
 0x931   :  { %2553 = vpow2.f32 %v2029_v0 }
 0x938   :  { %v2548_v33 = vpop.eup %2547 }
 0x939   :  { %v2550_v35 = vpop.eup %2549  ;;  %v2008_v36 = vmul.f32 1.0614054, %v2548_v33 }
 0x93a   :  { %v2007_v38 = vmul.f32 1.0614054, %v2550_v35  ;;  %v2552_v55 = vpop.eup %2551 }
 0x93b   :  { %v2010_v39 = vadd.f32 -1.4531521, %v2008_v36  ;;  %v2554_v57 = vpop.eup %2553 }
 0x93c   :  { %v2009_v1 = vadd.f32 -1.4531521, %v2007_v38 }
 0x93d   :  { %v2012_v41 = vmul.f32 %v2548_v33, %v2010_v39 }
 0x93e   :  { %v2011_v42 = vmul.f32 %v2550_v35, %v2009_v1 }
 0x93f   :  { %v2014_v43 = vadd.f32 1.4214138, %v2012_v41 }
 0x940   :  { %v2013_v44 = vadd.f32 1.4214138, %v2011_v42 }
 0x941   :  { %v2016_v45 = vmul.f32 %v2548_v33, %v2014_v43 }
 0x942   :  { %v2015_v46 = vmul.f32 %v2550_v35, %v2013_v44 }
 0x943   :  { %v2018_v47 = vadd.f32 -0.28449672, %v2016_v45 }
 0x944   :  { %v2017_v49 = vadd.f32 -0.28449672, %v2015_v46 }
 0x945   :  { %v2020_v50 = vmul.f32 %v2548_v33, %v2018_v47 }
 0x946   :  { %v2019_v51 = vmul.f32 %v2550_v35, %v2017_v49 }
 0x947   :  { %v2022_v52 = vadd.f32 0.2548296, %v2020_v50 }
 0x948   :  { %v2021_v53 = vadd.f32 0.2548296, %v2019_v51 }
 0x949   :  { %v2024_v54 = vmul.f32 %v2548_v33, %v2022_v52 }
 0x94a   :  { %v2023_v56 = vmul.f32 %v2550_v35, %v2021_v53 }
 0x94b   :  { %v2034_v58 = vmul.f32 %v2552_v55, %v2024_v54 }
 0x94c   :  { %v2033_v59 = vmul.f32 %v2554_v57, %v2023_v56 }
 0x94d   :  { %v2036_v60 = vsub.f32 1.0, %v2034_v58 }
 0x94e   :  { %v2035_v61 = vsub.f32 1.0, %v2033_v59 }
 0x94f   :  { %v2040_v62 = vsub.f32 0.0, %v2036_v60 }
 0x950   :  { %v2039_v63 = vsub.f32 0.0, %v2035_v61 }
 0x951   :  { %v2042_v2 = vsel %vm2038_vm5, %v2036_v60, %v2040_v62 }
 0x952   :  { %v2044_v3 = vadd.f32 1.0, %v2042_v2  ;;  %v2041_v4 = vsel %vm2037_vm6, %v2035_v61, %v2039_v63 }
 0x953   :  { %v2043_v48 = vadd.f32 1.0, %v2041_v4 }
 0x954   :  { %v2046_v8 = vmul.f32 %v2044_v3, %v1994_v6 }
 0x955   :  { %v2045_v7 = vmul.f32 %v2043_v48, %v1993_v5 }
 0x957   :  { %2435 = vmatprep.mubr.msk.f32.mxu0 %vm2062_vm7, %v2045_v7 }
 0x958   :  { %2436 = vmatmul.mubr.msk.f32.vlgmr.msra.gmra.mrb[18].mxu0 %vm2062_vm7, %v2046_v8 }
 0xa2b   :  { %v2437_v11 = vpop.f32.mrb[18].mxu0 }
 0xa2c   :  { %v2141_v13 = vadd.f32 %v2437_v11, %v2209_v9  ;;  %v2135_v14 = vpop.f32.mrb[19].mxu0 }
 0xa2d   :  { %v2136_v15 = vadd.f32 %v2209_v9, %v2135_v14 }
 0xa2e   :  { %v2145_v16 = vadd.f32 %v2141_v13, %v3008_v34 }
 0xa2f   :  { %v2144_v17 = vadd.f32 %v2136_v15, %v3011_v12 }
 0xa30   :  { %2147 = vst.msk [vmem:[#allocation8 + $0x8] sm:$0xff] %vm102_vm0, %v2145_v16 }
 0xa31   :  { %2146 = vst.msk [vmem:[#allocation8] sm:$0xff] %vm102_vm0, %v2144_v17 }
 0xa32   :  { %2632 = shalt.err (!%p2629_p0)
}
 0xa33   :  { %s2633_s5 = scalar_lea.hbm %s3095_s17, 256 }
 0xa34   :  { %p2634_p1 = scmp.ne.s32.totalorder %s3095_s17, %s2633_s5  ;;  %p2637_p2 = scmp.lt.u32.totalorder %s2633_s5, %s3095_s17 }
 0xa36   :  { %p2639_p3 = pnand %p2637_p2, %p2634_p1 }
 0xa38   :  { %2642 = shalt.err (!%p2639_p3)
}
 0xa39   :  { %2159 = dma.vmem_to_hbm [thread:$0]  %s2154_s25, 256, %s3095_s17, [#allocation4], %s2651_s21, %s2651_s21, %s2652_s22  }
 0xa3a   :  { %2647 = dma.done.wait [#allocation4], 256  }
 0xa3b   :  { %2648 = vsyncadd [#allocation4], 4294967040 }
 0xa3c   :  { %2163 = vsyncpa [#allocation3], 1 }
 0xa3d   :  { %2164 = vsyncpa [#allocation6], 1 }
 0xa3e   :  { %2165 = vsyncpa [#allocation4], 1 }

</bundles_post_ra>
